<compile_context>
chip_gen: v7x
topology: tpu7x:2x2x1
jax: 0.10.0
libtpu: 0.0.40
codegen_flags: <defaults>
</compile_context>

<pallas_src>
import jax
import jax.numpy as jnp
from jax.experimental import pallas as pl
from jax.experimental.pallas import tpu as pltpu

# ---------------- model hyper-parameters (PyTorch module defaults) --------------------
NODE_FEAT = 64          # node_feature_dim
EDGE_FEAT = 16          # edge_feature_dim (edge encoder is dead code in the forward)
HIDDEN = 128            # hidden_dim -> activations are exactly lane-dense
NUM_LAYERS = 3
LN_EPS = 1e-5
LANE = 128

# ---------------- batching / tiling ----------------------------------------------------
NODES_PER_GRAPH = 16
GRAPHS_PER_BLOCK = 8                                     # 8 graphs x 16 nodes = 128 rows
NODES_PER_BLOCK = GRAPHS_PER_BLOCK * NODES_PER_GRAPH     # 128 node rows per grid step
NUM_BLOCKS = 2                                           # grid size ("parallel")
NUM_GRAPHS = GRAPHS_PER_BLOCK * NUM_BLOCKS               # 16
NUM_NODES = NODES_PER_BLOCK * NUM_BLOCKS                 # 256


# ---------------- fused Pallas kernel (one graph-block per grid step) ------------------
def fused_gnn_kernel(x_ref, a_ref, p_ref, w_node_ref, conv_w_ref, w_cls1_ref,
                     w_cls2_ref, bias_ref, out_ref):
    f32, bf16 = jnp.float32, jnp.bfloat16
    h2 = HIDDEN // 2

    # Unpack the packed bias / affine slab once (one DMA descriptor, hoisted).
    b_node = bias_ref[0:1, :]
    ln_g = bias_ref[1:2, :]
    ln_b = bias_ref[2:3, :]
    b_cls1 = bias_ref[6:7, 0:h2]
    b_cls2 = bias_ref[6:7, h2:h2 + 1]

    # Node encoder: Linear -> ReLU -> LayerNorm.  bf16 into the MXU, f32 accumulate,
    # all elementwise / LayerNorm statistics in f32 (v5e has no bf16 VPU/EUP).
    h = jnp.dot(x_ref[...].astype(bf16), w_node_ref[...],
                preferred_element_type=f32) + b_node
    h = jnp.maximum(h, 0.0)
    mean = jnp.mean(h, axis=-1, keepdims=True)
    var = jnp.mean((h - mean) ** 2, axis=-1, keepdims=True)
    h = (h - mean) * jax.lax.rsqrt(var + LN_EPS) * ln_g + ln_b

    # GCN stack: relu(A_norm @ (h @ W) + b), statically unrolled.  The (128,128)
    # diagonal A block and the activations stay VMEM/vreg resident across layers.
    a = a_ref[...]                                        # bf16
    for layer in range(NUM_LAYERS):
        w = conv_w_ref[layer]                             # (H, H) bf16, static index
        b = bias_ref[3 + layer:4 + layer, :]
        xw = jnp.dot(h.astype(bf16), w, preferred_element_type=f32)
        h = jnp.maximum(jnp.dot(a, xw.astype(bf16), preferred_element_type=f32) + b, 0.0)

    # Global mean pool over this block's graphs (averaging matmul) + classifier head.
    # TODO(synk): with guaranteed equal-sized graphs this can become a reshape + sublane
    #   mean (XLU) instead of an MXU pass.
    pooled = jnp.dot(p_ref[...].astype(bf16), h.astype(bf16),
                     preferred_element_type=f32)          # (Gb, H)
    c = jnp.dot(pooled.astype(bf16), w_cls1_ref[...],
                preferred_element_type=f32) + b_cls1      # (Gb, H/2)
    c = jnp.maximum(c, 0.0)
    # Final (H/2 -> 1) projection as a VPU lane reduction, written to a lane-dense
    # (Gb, 128) slab (unmasked vst); the wrapper slices [:, :1].
    logit = jnp.sum(c * w_cls2_ref[...], axis=-1, keepdims=True) + b_cls2
    out_ref[...] = jnp.broadcast_to(logit, (GRAPHS_PER_BLOCK, LANE))


def molecular_gnn_forward(prepared, x, a_norm_bf16, pmat):
    """Fused forward over a batch of disjoint graphs. Returns logits (num_graphs, 1)."""
    num_nodes = x.shape[0]
    num_graphs = pmat.shape[0]
    num_blocks = num_nodes // NODES_PER_BLOCK
    h2 = HIDDEN // 2

    flops_per_block = (
        2 * NODES_PER_BLOCK * NODE_FEAT * HIDDEN
        + NUM_LAYERS * (2 * NODES_PER_BLOCK * HIDDEN * HIDDEN
                        + 2 * NODES_PER_BLOCK * NODES_PER_BLOCK * HIDDEN)
        + 2 * GRAPHS_PER_BLOCK * NODES_PER_BLOCK * HIDDEN
        + 2 * GRAPHS_PER_BLOCK * HIDDEN * h2
        + 2 * GRAPHS_PER_BLOCK * h2
    )
    inputs = (x, a_norm_bf16, pmat, prepared["w_node"], prepared["conv_w"],
              prepared["w_cls1"], prepared["w_cls2_row"], prepared["bias_slab"])
    bytes_accessed = sum(int(a.size) * a.dtype.itemsize for a in inputs)
    bytes_accessed += num_graphs * LANE * 4
    cost = pl.CostEstimate(flops=num_blocks * flops_per_block,
                           transcendentals=num_nodes,           # LayerNorm rsqrt per row
                           bytes_accessed=bytes_accessed)

    out_slab = pl.pallas_call(
        fused_gnn_kernel,
        out_shape=jax.ShapeDtypeStruct((num_graphs, LANE), jnp.float32),
        grid_spec=pltpu.PrefetchScalarGridSpec(
            num_scalar_prefetch=0,
            grid=(num_blocks,),
            in_specs=[
                # per-block data tiles
                pl.BlockSpec((NODES_PER_BLOCK, NODE_FEAT), lambda i: (i, 0)),
                pl.BlockSpec((NODES_PER_BLOCK, NODES_PER_BLOCK), lambda i: (i, i)),
                pl.BlockSpec((GRAPHS_PER_BLOCK, NODES_PER_BLOCK), lambda i: (i, i)),
                # weights / bias slab: constant block index -> DMA'd once, VMEM-resident
                pl.BlockSpec((NODE_FEAT, HIDDEN), lambda i: (0, 0)),
                pl.BlockSpec((NUM_LAYERS, HIDDEN, HIDDEN), lambda i: (0, 0, 0)),
                pl.BlockSpec((HIDDEN, h2), lambda i: (0, 0)),
                pl.BlockSpec((1, h2), lambda i: (0, 0)),
                pl.BlockSpec((8, HIDDEN), lambda i: (0, 0)),
            ],
            out_specs=pl.BlockSpec((GRAPHS_PER_BLOCK, LANE), lambda i: (i, 0)),
        ),
        compiler_params=pltpu.CompilerParams(
            dimension_semantics=("parallel",)),   # v7x: both TensorCores split the blocks
        cost_estimate=cost,
    )(*inputs)
    return out_slab[:, :1]   # lane-dense slab -> (num_graphs, 1) logits


# ---------------- plain-JAX glue (graph preprocessing, parameter setup) ---------------
def gcn_norm_adj(edge_index, num_nodes):
    """Dense D^-1/2 (A + I) D^-1/2 with A[target, source], matching PyG GCNConv.
    Precomputed once per graph structure and reused across forwards."""
    src, dst = edge_index[0], edge_index[1]
    loop = jnp.arange(num_nodes, dtype=edge_index.dtype)
    src = jnp.concatenate([src, loop])
    dst = jnp.concatenate([dst, loop])
    a_hat = jnp.zeros((num_nodes, num_nodes), jnp.float32).at[dst, src].add(1.0)
    deg = a_hat.sum(axis=1)
    dinv = jnp.where(deg > 0, 1.0 / jnp.sqrt(deg), 0.0)
    return a_hat * dinv[:, None] * dinv[None, :]


def pool_matrix(batch, num_graphs):
    """[num_graphs, num_nodes] averaging matrix implementing global_mean_pool."""
    onehot = (batch[None, :] == jnp.arange(num_graphs)[:, None]).astype(jnp.float32)
    counts = onehot.sum(axis=1, keepdims=True)
    return onehot / jnp.maximum(counts, 1.0)


def _dense(key, fan_in, fan_out):
    return jax.random.normal(key, (fan_in, fan_out), jnp.float32) / jnp.sqrt(fan_in)


def init_params(key):
    ks = jax.random.split(key, 12)
    p = {}
    p["w_node"] = _dense(ks[0], NODE_FEAT, HIDDEN)
    p["b_node"] = jax.random.normal(ks[1], (1, HIDDEN), jnp.float32) * 0.01
    p["ln_g"] = jnp.ones((1, HIDDEN), jnp.float32)
    p["ln_b"] = jnp.zeros((1, HIDDEN), jnp.float32)
    p["conv_w"] = [_dense(ks[2 + i], HIDDEN, HIDDEN) for i in range(NUM_LAYERS)]
    p["conv_b"] = [jax.random.normal(ks[5 + i], (1, HIDDEN), jnp.float32) * 0.01
                   for i in range(NUM_LAYERS)]
    p["w_cls1"] = _dense(ks[8], HIDDEN, HIDDEN // 2)
    p["b_cls1"] = jax.random.normal(ks[9], (1, HIDDEN // 2), jnp.float32) * 0.01
    p["w_cls2"] = _dense(ks[10], HIDDEN // 2, 1)
    p["b_cls2"] = jax.random.normal(ks[11], (1, 1), jnp.float32) * 0.01
    return p


def prepare_params(p):
    """Pack biases into one (8, HIDDEN) f32 slab; cast MXU weights to bf16 (halves DMA)."""
    slab = jnp.zeros((8, HIDDEN), jnp.float32)
    slab = slab.at[0].set(p["b_node"][0])
    slab = slab.at[1].set(p["ln_g"][0])
    slab = slab.at[2].set(p["ln_b"][0])
    for i in range(NUM_LAYERS):
        slab = slab.at[3 + i].set(p["conv_b"][i][0])
    slab = slab.at[6, :HIDDEN // 2].set(p["b_cls1"][0])
    slab = slab.at[6, HIDDEN // 2].set(p["b_cls2"][0, 0])
    bf16 = jnp.bfloat16
    return {
        "w_node": p["w_node"].astype(bf16),                     # (F, H)
        "conv_w": jnp.stack(p["conv_w"], axis=0).astype(bf16),  # (L, H, H)
        "w_cls1": p["w_cls1"].astype(bf16),                     # (H, H/2)
        "w_cls2_row": p["w_cls2"].reshape(1, HIDDEN // 2),      # (1, H/2) f32 (VPU reduce)
        "bias_slab": slab,                                      # (8, H) f32
    }


def reference_forward(p, x, a_norm, pmat):
    """Pure-JAX f32 reference of the PyTorch forward (dropout = identity)."""
    h = x @ p["w_node"] + p["b_node"]
    h = jnp.maximum(h, 0.0)
    mean = jnp.mean(h, axis=-1, keepdims=True)
    var = jnp.mean((h - mean) ** 2, axis=-1, keepdims=True)
    h = (h - mean) * jax.lax.rsqrt(var + LN_EPS) * p["ln_g"] + p["ln_b"]
    for i in range(NUM_LAYERS):
        h = jnp.maximum(a_norm @ (h @ p["conv_w"][i]) + p["conv_b"][i], 0.0)
    pooled = pmat @ h
    c = jnp.maximum(pooled @ p["w_cls1"] + p["b_cls1"], 0.0)
    return c @ p["w_cls2"] + p["b_cls2"]


if __name__ == "__main__":
    key = jax.random.PRNGKey(0)
    k_param, k_x, k_e = jax.random.split(key, 3)

    params = init_params(k_param)
    prepared = prepare_params(params)

    # 16 graphs of 16 nodes each (nodes ordered by graph, like a PyG batch), chained
    # bidirectionally within each graph; no cross-graph edges.
    x = jax.random.normal(k_x, (NUM_NODES, NODE_FEAT), jnp.float32)
    src_list, dst_list = [], []
    for g in range(NUM_GRAPHS):
        base = g * NODES_PER_GRAPH
        for i in range(NODES_PER_GRAPH - 1):
            src_list += [base + i, base + i + 1]
            dst_list += [base + i + 1, base + i]
    edge_index = jnp.array([src_list, dst_list], dtype=jnp.int32)        # [2, 480]
    # edge_attr exists in the PyG Data object, but the reference forward's edge encoding
    # is never consumed downstream (GCNConv ignores edge features), so the dead
    # edge-encoder matmul + writeback were removed from the kernel (per perf review).
    edge_attr = jax.random.normal(k_e, (edge_index.shape[1], EDGE_FEAT), jnp.float32)
    batch = jnp.repeat(jnp.arange(NUM_GRAPHS, dtype=jnp.int32), NODES_PER_GRAPH)

    # Graph-structure preprocessing: computed ONCE per structure, reused across forwards.
    a_norm = gcn_norm_adj(edge_index, NUM_NODES)       # (N, N) f32
    pmat = pool_matrix(batch, NUM_GRAPHS)              # (G, N) f32

    # Batches of disjoint graphs have block-diagonal adjacency -> tiling only the
    # diagonal (128,128) A blocks across the grid is exact. Verify.
    blk = jnp.kron(jnp.eye(NUM_BLOCKS, dtype=jnp.float32),
                   jnp.ones((NODES_PER_BLOCK, NODES_PER_BLOCK), jnp.float32))
    assert float(jnp.abs(a_norm * (1.0 - blk)).max()) == 0.0

    a_norm_bf16 = a_norm.astype(jnp.bfloat16)          # halve A DMA bytes / VMEM footprint

    fwd = jax.jit(molecular_gnn_forward)
    out = fwd(prepared, x, a_norm_bf16, pmat)
    out = jax.block_until_ready(out)

    assert out.shape == (NUM_GRAPHS, 1) and out.dtype == jnp.float32
    assert bool(jnp.all(jnp.isfinite(out)))

    # Numerical check vs pure-JAX f32 reference (tolerance covers bf16 MXU inputs).
    ref = reference_forward(params, x, a_norm, pmat)
    err = float(jnp.max(jnp.abs(out - ref) / (jnp.abs(ref) + 1.0)))
    assert err < 0.2, f"kernel vs f32 reference mismatch: {err}"

    print("KERNEL_OK")
</pallas_src>

<mosaic_0001>
module attributes {stable_mosaic.version = 11 : i64} {
  func.func @fused_gnn_kernel(%arg0: i32, %arg1: memref<128x64xf32, #tpu.memory_space<vmem>>, %arg2: memref<128x128xbf16, #tpu.memory_space<vmem>>, %arg3: memref<8x128xf32, #tpu.memory_space<vmem>>, %arg4: memref<64x128xbf16, #tpu.memory_space<vmem>>, %arg5: memref<3x128x128xbf16, #tpu.memory_space<vmem>>, %arg6: memref<128x64xbf16, #tpu.memory_space<vmem>>, %arg7: memref<1x64xf32, #tpu.memory_space<vmem>>, %arg8: memref<8x128xf32, #tpu.memory_space<vmem>>, %arg9: memref<8x128xf32, #tpu.memory_space<vmem>>) attributes {dimension_semantics = [#tpu.dimension_semantics<parallel>], iteration_bounds = array<i64: 2>, scalar_prefetch = 0 : i64, scratch_operands = 0 : i64, tpu.core_type = #tpu.core_type<tc>, window_params = [{transform_indices = @transform_0, window_bounds = array<i64: 128, 64>}, {transform_indices = @transform_1, window_bounds = array<i64: 128, 128>}, {transform_indices = @transform_2, window_bounds = array<i64: 8, 128>}, {pipeline_mode = #tpu.pipeline_mode<synchronous>, transform_indices = @transform_3, window_bounds = array<i64: 64, 128>}, {pipeline_mode = #tpu.pipeline_mode<synchronous>, transform_indices = @transform_4, window_bounds = array<i64: 3, 128, 128>}, {pipeline_mode = #tpu.pipeline_mode<synchronous>, transform_indices = @transform_5, window_bounds = array<i64: 128, 64>}, {pipeline_mode = #tpu.pipeline_mode<synchronous>, transform_indices = @transform_6, window_bounds = array<i64: 1, 64>}, {pipeline_mode = #tpu.pipeline_mode<synchronous>, transform_indices = @transform_7, window_bounds = array<i64: 8, 128>}, {transform_indices = @transform_8, window_bounds = array<i64: 8, 128>}]} {
    %c0 = arith.constant 0 : index
    %c0_0 = arith.constant 0 : index
    %0 = vector.load %arg8[%c0, %c0_0] : memref<8x128xf32, #tpu.memory_space<vmem>>, vector<1x128xf32>
    %c1 = arith.constant 1 : index
    %c0_1 = arith.constant 0 : index
    %1 = vector.load %arg8[%c1, %c0_1] : memref<8x128xf32, #tpu.memory_space<vmem>>, vector<1x128xf32>
    %c2 = arith.constant 2 : index
    %c0_2 = arith.constant 0 : index
    %2 = vector.load %arg8[%c2, %c0_2] : memref<8x128xf32, #tpu.memory_space<vmem>>, vector<1x128xf32>
    %c6 = arith.constant 6 : index
    %c0_3 = arith.constant 0 : index
    %3 = vector.load %arg8[%c6, %c0_3] : memref<8x128xf32, #tpu.memory_space<vmem>>, vector<1x64xf32>
    %c6_4 = arith.constant 6 : index
    %c64 = arith.constant 64 : index
    %4 = vector.load %arg8[%c6_4, %c64] : memref<8x128xf32, #tpu.memory_space<vmem>>, vector<1x1xf32>
    %c0_5 = arith.constant 0 : index
    %c0_6 = arith.constant 0 : index
    %5 = vector.load %arg1[%c0_5, %c0_6] : memref<128x64xf32, #tpu.memory_space<vmem>>, vector<128x64xf32>
    %6 = arith.truncf %5 : vector<128x64xf32> to vector<128x64xbf16>
    %c0_7 = arith.constant 0 : index
    %c0_8 = arith.constant 0 : index
    %7 = vector.load %arg4[%c0_7, %c0_8] : memref<64x128xbf16, #tpu.memory_space<vmem>>, vector<64x128xbf16>
    %cst = arith.constant dense<0.000000e+00> : vector<128x128xf32>
    %8 = tpu.matmul %6, %7, %cst {dimension_numbers = #tpu.dot_dimension_numbers<[1], [0], [0], [1], [0, 0, 1, 1], [], []>} : vector<128x64xbf16>, vector<64x128xbf16>, vector<128x128xf32> -> vector<128x128xf32>
    %9 = vector.broadcast %0 : vector<1x128xf32> to vector<128x128xf32>
    %10 = arith.addf %8, %9 : vector<128x128xf32>
    %cst_9 = arith.constant 0.000000e+00 : f32
    %11 = vector.broadcast %cst_9 : f32 to vector<128x128xf32>
    %12 = arith.maximumf %10, %11 : vector<128x128xf32>
    %cst_10 = arith.constant dense<0.000000e+00> : vector<128xf32>
    %13 = vector.multi_reduction <add>, %12, %cst_10 [1] : vector<128x128xf32> to vector<128xf32>
    %14 = vector.shape_cast %13 : vector<128xf32> to vector<128x1xf32>
    %cst_11 = arith.constant 1.280000e+02 : f32
    %15 = vector.broadcast %cst_11 : f32 to vector<128x1xf32>
    %16 = arith.divf %14, %15 : vector<128x1xf32>
    %17 = vector.broadcast %16 : vector<128x1xf32> to vector<128x128xf32>
    %18 = arith.subf %12, %17 : vector<128x128xf32>
    %19 = arith.mulf %18, %18 : vector<128x128xf32>
    %cst_12 = arith.constant dense<0.000000e+00> : vector<128xf32>
    %20 = vector.multi_reduction <add>, %19, %cst_12 [1] : vector<128x128xf32> to vector<128xf32>
    %21 = vector.shape_cast %20 : vector<128xf32> to vector<128x1xf32>
    %cst_13 = arith.constant 1.280000e+02 : f32
    %22 = vector.broadcast %cst_13 : f32 to vector<128x1xf32>
    %23 = arith.divf %21, %22 : vector<128x1xf32>
    %24 = vector.broadcast %16 : vector<128x1xf32> to vector<128x128xf32>
    %25 = arith.subf %12, %24 : vector<128x128xf32>
    %cst_14 = arith.constant 9.99999974E-6 : f32
    %26 = vector.broadcast %cst_14 : f32 to vector<128x1xf32>
    %27 = arith.addf %23, %26 : vector<128x1xf32>
    %28 = math.rsqrt %27 : vector<128x1xf32>
    %29 = vector.broadcast %28 : vector<128x1xf32> to vector<128x128xf32>
    %30 = arith.mulf %25, %29 : vector<128x128xf32>
    %31 = vector.broadcast %1 : vector<1x128xf32> to vector<128x128xf32>
    %32 = arith.mulf %30, %31 : vector<128x128xf32>
    %33 = vector.broadcast %2 : vector<1x128xf32> to vector<128x128xf32>
    %34 = arith.addf %32, %33 : vector<128x128xf32>
    %c0_15 = arith.constant 0 : index
    %c0_16 = arith.constant 0 : index
    %35 = vector.load %arg2[%c0_15, %c0_16] : memref<128x128xbf16, #tpu.memory_space<vmem>>, vector<128x128xbf16>
    %c0_17 = arith.constant 0 : index
    %c0_18 = arith.constant 0 : index
    %c0_19 = arith.constant 0 : index
    %36 = vector.load %arg5[%c0_17, %c0_18, %c0_19] : memref<3x128x128xbf16, #tpu.memory_space<vmem>>, vector<1x128x128xbf16>
    %37 = vector.shape_cast %36 : vector<1x128x128xbf16> to vector<128x128xbf16>
    %c3 = arith.constant 3 : index
    %c0_20 = arith.constant 0 : index
    %38 = vector.load %arg8[%c3, %c0_20] : memref<8x128xf32, #tpu.memory_space<vmem>>, vector<1x128xf32>
    %39 = arith.truncf %34 : vector<128x128xf32> to vector<128x128xbf16>
    %cst_21 = arith.constant dense<0.000000e+00> : vector<128x128xf32>
    %40 = tpu.matmul %39, %37, %cst_21 {dimension_numbers = #tpu.dot_dimension_numbers<[1], [0], [0], [1], [0, 0, 1, 1], [], []>} : vector<128x128xbf16>, vector<128x128xbf16>, vector<128x128xf32> -> vector<128x128xf32>
    %41 = arith.truncf %40 : vector<128x128xf32> to vector<128x128xbf16>
    %cst_22 = arith.constant dense<0.000000e+00> : vector<128x128xf32>
    %42 = tpu.matmul %35, %41, %cst_22 {dimension_numbers = #tpu.dot_dimension_numbers<[1], [0], [0], [1], [0, 0, 1, 1], [], []>} : vector<128x128xbf16>, vector<128x128xbf16>, vector<128x128xf32> -> vector<128x128xf32>
    %43 = vector.broadcast %38 : vector<1x128xf32> to vector<128x128xf32>
    %44 = arith.addf %42, %43 : vector<128x128xf32>
    %cst_23 = arith.constant 0.000000e+00 : f32
    %45 = vector.broadcast %cst_23 : f32 to vector<128x128xf32>
    %46 = arith.maximumf %44, %45 : vector<128x128xf32>
    %c1_24 = arith.constant 1 : index
    %c0_25 = arith.constant 0 : index
    %c0_26 = arith.constant 0 : index
    %47 = vector.load %arg5[%c1_24, %c0_25, %c0_26] : memref<3x128x128xbf16, #tpu.memory_space<vmem>>, vector<1x128x128xbf16>
    %48 = vector.shape_cast %47 : vector<1x128x128xbf16> to vector<128x128xbf16>
    %c4 = arith.constant 4 : index
    %c0_27 = arith.constant 0 : index
    %49 = vector.load %arg8[%c4, %c0_27] : memref<8x128xf32, #tpu.memory_space<vmem>>, vector<1x128xf32>
    %50 = arith.truncf %46 : vector<128x128xf32> to vector<128x128xbf16>
    %cst_28 = arith.constant dense<0.000000e+00> : vector<128x128xf32>
    %51 = tpu.matmul %50, %48, %cst_28 {dimension_numbers = #tpu.dot_dimension_numbers<[1], [0], [0], [1], [0, 0, 1, 1], [], []>} : vector<128x128xbf16>, vector<128x128xbf16>, vector<128x128xf32> -> vector<128x128xf32>
    %52 = arith.truncf %51 : vector<128x128xf32> to vector<128x128xbf16>
    %cst_29 = arith.constant dense<0.000000e+00> : vector<128x128xf32>
    %53 = tpu.matmul %35, %52, %cst_29 {dimension_numbers = #tpu.dot_dimension_numbers<[1], [0], [0], [1], [0, 0, 1, 1], [], []>} : vector<128x128xbf16>, vector<128x128xbf16>, vector<128x128xf32> -> vector<128x128xf32>
    %54 = vector.broadcast %49 : vector<1x128xf32> to vector<128x128xf32>
    %55 = arith.addf %53, %54 : vector<128x128xf32>
    %cst_30 = arith.constant 0.000000e+00 : f32
    %56 = vector.broadcast %cst_30 : f32 to vector<128x128xf32>
    %57 = arith.maximumf %55, %56 : vector<128x128xf32>
    %c2_31 = arith.constant 2 : index
    %c0_32 = arith.constant 0 : index
    %c0_33 = arith.constant 0 : index
    %58 = vector.load %arg5[%c2_31, %c0_32, %c0_33] : memref<3x128x128xbf16, #tpu.memory_space<vmem>>, vector<1x128x128xbf16>
    %59 = vector.shape_cast %58 : vector<1x128x128xbf16> to vector<128x128xbf16>
    %c5 = arith.constant 5 : index
    %c0_34 = arith.constant 0 : index
    %60 = vector.load %arg8[%c5, %c0_34] : memref<8x128xf32, #tpu.memory_space<vmem>>, vector<1x128xf32>
    %61 = arith.truncf %57 : vector<128x128xf32> to vector<128x128xbf16>
    %cst_35 = arith.constant dense<0.000000e+00> : vector<128x128xf32>
    %62 = tpu.matmul %61, %59, %cst_35 {dimension_numbers = #tpu.dot_dimension_numbers<[1], [0], [0], [1], [0, 0, 1, 1], [], []>} : vector<128x128xbf16>, vector<128x128xbf16>, vector<128x128xf32> -> vector<128x128xf32>
    %63 = arith.truncf %62 : vector<128x128xf32> to vector<128x128xbf16>
    %cst_36 = arith.constant dense<0.000000e+00> : vector<128x128xf32>
    %64 = tpu.matmul %35, %63, %cst_36 {dimension_numbers = #tpu.dot_dimension_numbers<[1], [0], [0], [1], [0, 0, 1, 1], [], []>} : vector<128x128xbf16>, vector<128x128xbf16>, vector<128x128xf32> -> vector<128x128xf32>
    %65 = vector.broadcast %60 : vector<1x128xf32> to vector<128x128xf32>
    %66 = arith.addf %64, %65 : vector<128x128xf32>
    %cst_37 = arith.constant 0.000000e+00 : f32
    %67 = vector.broadcast %cst_37 : f32 to vector<128x128xf32>
    %68 = arith.maximumf %66, %67 : vector<128x128xf32>
    %c0_38 = arith.constant 0 : index
    %c0_39 = arith.constant 0 : index
    %69 = vector.load %arg3[%c0_38, %c0_39] : memref<8x128xf32, #tpu.memory_space<vmem>>, vector<8x128xf32>
    %70 = arith.truncf %69 : vector<8x128xf32> to vector<8x128xbf16>
    %71 = arith.truncf %68 : vector<128x128xf32> to vector<128x128xbf16>
    %cst_40 = arith.constant dense<0.000000e+00> : vector<8x128xf32>
    %72 = tpu.matmul %70, %71, %cst_40 {dimension_numbers = #tpu.dot_dimension_numbers<[1], [0], [0], [1], [0, 0, 1, 1], [], []>} : vector<8x128xbf16>, vector<128x128xbf16>, vector<8x128xf32> -> vector<8x128xf32>
    %73 = arith.truncf %72 : vector<8x128xf32> to vector<8x128xbf16>
    %c0_41 = arith.constant 0 : index
    %c0_42 = arith.constant 0 : index
    %74 = vector.load %arg6[%c0_41, %c0_42] : memref<128x64xbf16, #tpu.memory_space<vmem>>, vector<128x64xbf16>
    %cst_43 = arith.constant dense<0.000000e+00> : vector<8x64xf32>
    %75 = tpu.matmul %73, %74, %cst_43 {dimension_numbers = #tpu.dot_dimension_numbers<[1], [0], [0], [1], [0, 0, 1, 1], [], []>} : vector<8x128xbf16>, vector<128x64xbf16>, vector<8x64xf32> -> vector<8x64xf32>
    %76 = vector.broadcast %3 : vector<1x64xf32> to vector<8x64xf32>
    %77 = arith.addf %75, %76 : vector<8x64xf32>
    %cst_44 = arith.constant 0.000000e+00 : f32
    %78 = vector.broadcast %cst_44 : f32 to vector<8x64xf32>
    %79 = arith.maximumf %77, %78 : vector<8x64xf32>
    %c0_45 = arith.constant 0 : index
    %c0_46 = arith.constant 0 : index
    %80 = vector.load %arg7[%c0_45, %c0_46] : memref<1x64xf32, #tpu.memory_space<vmem>>, vector<1x64xf32>
    %81 = vector.broadcast %80 : vector<1x64xf32> to vector<8x64xf32>
    %82 = arith.mulf %79, %81 : vector<8x64xf32>
    %cst_47 = arith.constant dense<0.000000e+00> : vector<8xf32>
    %83 = vector.multi_reduction <add>, %82, %cst_47 [1] : vector<8x64xf32> to vector<8xf32>
    %84 = vector.shape_cast %83 : vector<8xf32> to vector<8x1xf32>
    %85 = vector.broadcast %4 : vector<1x1xf32> to vector<8x1xf32>
    %86 = arith.addf %84, %85 : vector<8x1xf32>
    %87 = vector.shape_cast %86 : vector<8x1xf32> to vector<8x1xf32>
    %88 = vector.broadcast %87 : vector<8x1xf32> to vector<8x128xf32>
    %c0_48 = arith.constant 0 : index
    %c0_49 = arith.constant 0 : index
    %89 = vector.load %arg9[%c0_48, %c0_49] : memref<8x128xf32, #tpu.memory_space<vmem>>, vector<8x128xf32>
    tpu.vector_store %arg9[%c0_48, %c0_49], %88 {strides = array<i32>} : memref<8x128xf32, #tpu.memory_space<vmem>>, vector<8x128xf32>,
    return
  }
  func.func @transform_0(%arg0: i32) -> (i32, i32) {
    %c0_i32 = arith.constant 0 : i32
    %c0_i32_0 = arith.constant 0 : i32
    return %arg0, %c0_i32 : i32, i32
  }
  func.func @transform_1(%arg0: i32) -> (i32, i32) {
    %c0_i32 = arith.constant 0 : i32
    return %arg0, %arg0 : i32, i32
  }
  func.func @transform_2(%arg0: i32) -> (i32, i32) {
    %c0_i32 = arith.constant 0 : i32
    return %arg0, %arg0 : i32, i32
  }
  func.func @transform_3(%arg0: i32) -> (i32, i32) {
    %c0_i32 = arith.constant 0 : i32
    %c0_i32_0 = arith.constant 0 : i32
    %c0_i32_1 = arith.constant 0 : i32
    return %c0_i32, %c0_i32_0 : i32, i32
  }
  func.func @transform_4(%arg0: i32) -> (i32, i32, i32) {
    %c0_i32 = arith.constant 0 : i32
    %c0_i32_0 = arith.constant 0 : i32
    %c0_i32_1 = arith.constant 0 : i32
    %c0_i32_2 = arith.constant 0 : i32
    return %c0_i32, %c0_i32_0, %c0_i32_1 : i32, i32, i32
  }
  func.func @transform_5(%arg0: i32) -> (i32, i32) {
    %c0_i32 = arith.constant 0 : i32
    %c0_i32_0 = arith.constant 0 : i32
    %c0_i32_1 = arith.constant 0 : i32
    return %c0_i32, %c0_i32_0 : i32, i32
  }
  func.func @transform_6(%arg0: i32) -> (i32, i32) {
    %c0_i32 = arith.constant 0 : i32
    %c0_i32_0 = arith.constant 0 : i32
    %c0_i32_1 = arith.constant 0 : i32
    return %c0_i32, %c0_i32_0 : i32, i32
  }
  func.func @transform_7(%arg0: i32) -> (i32, i32) {
    %c0_i32 = arith.constant 0 : i32
    %c0_i32_0 = arith.constant 0 : i32
    %c0_i32_1 = arith.constant 0 : i32
    return %c0_i32, %c0_i32_0 : i32, i32
  }
  func.func @transform_8(%arg0: i32) -> (i32, i32) {
    %c0_i32 = arith.constant 0 : i32
    %c0_i32_0 = arith.constant 0 : i32
    return %arg0, %c0_i32 : i32, i32
  }
}

</mosaic_0001>

<bundles_post_ra>
// kernel: molecular_gnn_forward.1
= control target key start
LH: loop header
LB: loop body
LE: loop exit
PB: predicated region body
PF: predicated region fallthrough
CT: control target
= control target key end

     0   :  { %13 = vsyncpa [#allocation4], 0  ;;  %s2850_s27 = smov 0   ;;  %s2852_s28 = smov 0   ;;  %s3437_s0 = inlined_call_operand.vmem [shape: f32[256,64], index: 0, kind: input, shape index: {}]   ;;  %s3438_s1 = inlined_call_operand.vmem [shape: bf16[256,256], index: 1, kind: input, shape index: {}]   ;;  %s3439_s2 = inlined_call_operand.vmem [shape: f32[16,256], index: 2, kind: input, shape index: {}]   ;;  %s3440_s3 = inlined_call_operand.hbm [shape: bf16[64,128], index: 3, kind: input, shape index: {}]   ;;  %s3441_s4 = inlined_call_operand.vmem [shape: bf16[3,128,128], index: 4, kind: input, shape index: {}]   ;;  %s3442_s5 = inlined_call_operand.vmem [shape: bf16[128,64], index: 5, kind: input, shape index: {}]   ;;  %s3443_s6 = inlined_call_operand.vmem [shape: f32[1,64], index: 6, kind: input, shape index: {}]   ;;  %s3444_s7 = inlined_call_operand.vmem [shape: f32[8,128], index: 7, kind: input, shape index: {}]   ;;  %s3445_s8 = inlined_call_operand.vmem [shape: f32[16,128], index: 8, kind: output, shape index: {}]  }
   0x1   :  { %s2854_s29 = smov 0  }
   0x2 LB: > { %s2866_s30 = sadd.s32 4294967295, %s2797_s29   ;;  %s2869_s9 = sadd.s32 1, %s2797_s29   ;;  %s2797_s29 = sphi %s2854_s29, %s3457_s29   ;;  %s2793_s28 = sphi %s2852_s28, %s3456_s28   ;;  %s2789_s27 = sphi %s2850_s27, %s3455_s27  }
   0x3   : > { %s49_s10 = ssub.s32 %s2797_s29, %s2869_s9  ;;  %s54_s11 = sadd.s32 1, %s2793_s28 }
   0x4   : > { %s51_s12 = sor.u32 %s49_s10, %s49_s10  ;;  %p61_p0 = scmp.ne.s32.totalorder %s2793_s28, %s2789_s27 }
   0x5   : > { %p52_p1 = scmp.eq.s32.totalorder %s51_s12, 0  ;;  %p62_p2 = scmp.eq.s32.totalorder %s2797_s29, 0 }
   0x6   : > { %p2133_p3 = scmp.ge.s32.totalorder %s2797_s29, 1  ;;  %p237_p4 = scmp.lt.s32.totalorder %s2797_s29, 3 }
   0x7   : > { %s2880_s13 = scalar_select %p52_p1, %s2793_s28, %s54_s11  }
   0x8   : > { %p2882_p5 = por %p62_p2, %p61_p0  ;;  %p2886_p6 = pnand %p2133_p3, %p237_p4 }
   0x9   : > { %p3446_p7 = scmp.eq.s32.totalorder %s2866_s30, 0  ;;  %s2799_s16 = smov [#allocation3]  }
   0xa   : > { %s3448_s14 = scalar_select %p2882_p5, 1, 0 }
   0xb   : > { %s3449_s15 = scalar_select %p2886_p6, 1, 0 }
   0xc   : > { %p2629_p8 = pneg %p2886_p6  ;;  %s249_s17 = sshll.u32 %s2799_s16, 4  ;;  %s250_s17 = int_to_ptr.vmem [resolvable:$true] %s249_s17 }
   0xd   : > { %s2743_s21 = scalar_lea.hbm %s3440_s3, 512 }
   0xe   : > { %p2895_p9 = pnand %p3446_p7, %p2629_p8  ;;  %p2744_p10 = scmp.ne.s32.totalorder %s3440_s3, %s2743_s21 }
   0xf   : > { %p2750_p0 = scmp.lt.u32.totalorder %s2743_s21, %s3440_s3 }
  0x10   : > { %p2745_p11 = pneg %p2895_p9 }
  0x12   : > { %p2746_p12 = pnand %p2745_p11, %p2744_p10 }
  0x14   : > { %p2747_p13 = pneg %p2746_p12 }
  0x16   : > { %p2752_p1 = pnand %p2750_p0, %p2747_p13 }
  0x18   : > { %2755 = shalt.err (!%p2752_p1)
}
  0x19   : > { %s2756_s26 = scalar_lea.vmem %s250_s17, 512  ;;  %p2764_p8 = scmp.lt.s32.totalorder %s250_s17, %s250_s17 }
  0x1a   : > { %p2757_p2 = scmp.ne.s32.totalorder %s250_s17, %s2756_s26  ;;  %p2765_p7 = scmp.lt.s32.totalorder %s2756_s26, %s2756_s26 }
  0x1c   : > { %p2759_p3 = pnand %p2757_p2, %p2745_p11  ;;  %p2766_p6 = por %p2765_p7, %p2764_p8 }
  0x1e   : > { %p2760_p4 = pneg %p2759_p3 }
  0x20   : > { %p2767_p5 = pnand %p2766_p6, %p2760_p4 }
  0x22   : > { %2770 = shalt.err (!%p2767_p5)
}
  0x23   : > { %s2800_s10 = smov 64   ;;  %s2801_s11 = smov 4  }
  0x24   : > { %2632 = dma.hbm_to_vmem [thread:$0]  (!%p2895_p9), %s3440_s3, 512, %s250_s17, [#allocation4], %s2800_s10, %s2800_s10, %s2801_s11  }
  0x25   : > { %p2135_p10 = scmp.ge.s32.totalorder %s2797_s29, 2 }
  0x26   : > { %p3451_p12 = scmp.ne.s32.totalorder (!%p2135_p10), %s3448_s14, 0 }
  0x27   : > { %271 = sbr.rel (%p2135_p10) target bundleno = 62 (0x3e), region = 36 }
  0x2e   : > { %283 = sbr.rel (!%p3451_p12) target bundleno = 62 (0x3e), region = 44  ;;  %s285_s19 = sand.u32 (%p3451_p12), 1, %s2793_s28  }
  0x2f   : > { %s2242_s20 = sshll.u32 (%p3451_p12), %s2797_s29, 5  ;;  %s2136_s21 = sshll.u32 (%p3451_p12), %s285_s19, 6 }
  0x30   : > { %s290_s22 = sadd.s32 (%p3451_p12), %s2797_s29, %s2242_s20  ;;  %s287_s14 = scalar_lea.vmem (%p3451_p12), [#allocation2], %s2136_s21 }
  0x31   : > { %s2139_s23 = sshll.u32 (%p3451_p12), %s290_s22, 2 }
  0x32   : > { %s2924_s25 = scalar_lea.vmem (%p3451_p12), %s3438_s1, %s2139_s23 }
  0x33   : > { %v308_v0 = vld [vmem:[%s2924_s25] sm:$0xf] (%p3451_p12)  ;;  %v310_v1 = vld [vmem:[%s2924_s25 + $0x8] sm:$0xf] (%p3451_p12)  ;;  %v312_v2 = vld [vmem:[%s2924_s25 + $0x10] sm:$0xf] (%p3451_p12) }
  0x34   : > { %309 = vst [vmem:[%s287_s14] sm:$0xf] (%p3451_p12), %v308_v0  ;;  %311 = vst [vmem:[%s287_s14 + $0x4] sm:$0xf] (%p3451_p12), %v310_v1  ;;  %v314_v3 = vld [vmem:[%s2924_s25 + $0x18] sm:$0xf] (%p3451_p12) }
  0x35   : > { %313 = vst [vmem:[%s287_s14 + $0x8] sm:$0xf] %v312_v2  ;;  %v316_v4 = vld [vmem:[%s2924_s25 + $0x20] sm:$0xf]  ;;  %v318_v5 = vld [vmem:[%s2924_s25 + $0x28] sm:$0xf] }
  0x36   : > { %315 = vst [vmem:[%s287_s14 + $0xc] sm:$0xf] %v314_v3  ;;  %317 = vst [vmem:[%s287_s14 + $0x10] sm:$0xf] %v316_v4  ;;  %v320_v6 = vld [vmem:[%s2924_s25 + $0x30] sm:$0xf] }
  0x37   : > { %319 = vst [vmem:[%s287_s14 + $0x14] sm:$0xf] %v318_v5  ;;  %v322_v7 = vld [vmem:[%s2924_s25 + $0x38] sm:$0xf]  ;;  %v324_v8 = vld [vmem:[%s2924_s25 + $0x40] sm:$0xf] }
  0x38   : > { %321 = vst [vmem:[%s287_s14 + $0x18] sm:$0xf] %v320_v6  ;;  %323 = vst [vmem:[%s287_s14 + $0x1c] sm:$0xf] %v322_v7  ;;  %v326_v9 = vld [vmem:[%s2924_s25 + $0x48] sm:$0xf] }
  0x39   : > { %325 = vst [vmem:[%s287_s14 + $0x20] sm:$0xf] %v324_v8  ;;  %v328_v10 = vld [vmem:[%s2924_s25 + $0x50] sm:$0xf]  ;;  %v330_v11 = vld [vmem:[%s2924_s25 + $0x58] sm:$0xf] }
  0x3a   : > { %327 = vst [vmem:[%s287_s14 + $0x24] sm:$0xf] %v326_v9  ;;  %329 = vst [vmem:[%s287_s14 + $0x28] sm:$0xf] %v328_v10  ;;  %v332_v12 = vld [vmem:[%s2924_s25 + $0x60] sm:$0xf] }
  0x3b   : > { %331 = vst [vmem:[%s287_s14 + $0x2c] sm:$0xf] %v330_v11  ;;  %v334_v13 = vld [vmem:[%s2924_s25 + $0x68] sm:$0xf]  ;;  %v336_v14 = vld [vmem:[%s2924_s25 + $0x70] sm:$0xf] }
  0x3c   : > { %333 = vst [vmem:[%s287_s14 + $0x30] sm:$0xf] %v332_v12  ;;  %335 = vst [vmem:[%s287_s14 + $0x34] sm:$0xf] %v334_v13  ;;  %v338_v15 = vld [vmem:[%s2924_s25 + $0x78] sm:$0xf] }
  0x3d   : > { %337 = vst [vmem:[%s287_s14 + $0x38] sm:$0xf] %v336_v14  ;;  %339 = vst [vmem:[%s287_s14 + $0x3c] sm:$0xf] %v338_v15 }
  0x3e PF: > { %p3452_p5 = scmp.ne.s32.totalorder %s3449_s15, 0 }
  0x3f   : > { %s411_s29 = sand.u32 (!%p3452_p5), 1, %s2789_s27   ;;  %p3453_p6 = scmp.eq.s32.totalorder (!%p3452_p5), %s2866_s30, 0 }
  0x40   : > { %408 = sbr.rel (%p3452_p5) target bundleno = 2776 (0xad8), region = 89  ;;  %s2141_s17 = sshll.u32 (!%p3452_p5), %s411_s29, 6 }
  0x41   : > { %s2945_s26 = scalar_lea.vmem (!%p3452_p5), [#allocation2], %s2141_s17 }
  0x47   : > { %2784 = dma.done.wait (%p3453_p6), [#allocation4], 512   ;;  %p3454_p7 = pmov %p3453_p6 }
  0x48   : > { %s2143_s10 = sshll.u32 %s2866_s30, 4  ;;  %v2667_v16 = vld [vmem:[#allocation3] sm:$0xff]   ;;  %v2668_v17 = vld [vmem:[#allocation3 + $0x8] sm:$0xff]   ;;  %v2669_v18 = vld [vmem:[#allocation3 + $0x10] sm:$0xff]   ;;  %vm544_vm0 = vcmask 523264   ;;  %vm2803_vm1 = vmmov 0  }
  0x49   : > { %2786 = vsyncadd (%p3454_p7), [#allocation4], 4294966784  ;;  %p461_p9 = scmp.lt.s32.totalorder %s2143_s10, 31  ;;  %2369 = vmatprep.subr.bf16.mxu0 %v2667_v16  ;;  %v2670_v22 = vld [vmem:[#allocation3 + $0x18] sm:$0xff]   ;;  %v2148_v44 = vld [vmem:[%s3444_s7] ss:$0 sm:$0xff] }
  0x4a   : > { %2370 = vmatpush3.bf16.msra.mxu0 %v2667_v16  ;;  %p467_p11 = scmp.lt.s32.totalorder %s2866_s30, 1 }
  0x4b   : > { %s3459_s10 = smov (!%p461_p9, %s2143_s10), 31  ;;  %2371 = vmatprep.subr.bf16.mxu0 %v2668_v17 }
  0x4c   : > { %s2144_s11 = sshll.u32 %s3459_s10, 3  ;;  %s3461_s30 = smov (!%p467_p11, %s2866_s30), 1 }
  0x4d   : > { %s2955_s16 = scalar_lea.vmem %s3437_s0, %s2144_s11  ;;  %s2145_s22 = sshll.u32 %s3461_s30, 1 }
  0x4e   : > { %v484_v19 = vld [vmem:[%s2955_s16] sm:$0xff]  ;;  %v485_v20 = vld [vmem:[%s2955_s16 + $0x8] sm:$0xff]  ;;  %2372 = vmatpush3.bf16.msra.mxu0 %v2668_v17  ;;  %v486_v23 = vld [vmem:[%s2955_s16 + $0x10] sm:$0xff]  ;;  %s472_s23 = sadd.s32 %s2145_s22, %s3461_s30  ;;  %s2147_s12 = sshll.u32 %s3461_s30, 3 }
  0x4f   : > { %v500_v21 = vpack.c.bf16 %v485_v20, %v484_v19  ;;  %2373 = vmatprep.subr.bf16.mxu0 %v2669_v18  ;;  %v487_v24 = vld [vmem:[%s2955_s16 + $0x18] sm:$0xff]  ;;  %v488_v25 = vld [vmem:[%s2955_s16 + $0x20] sm:$0xff]  ;;  %v489_v26 = vld [vmem:[%s2955_s16 + $0x28] sm:$0xff]  ;;  %s478_s19 = scalar_lea.vmem %s3445_s8, %s2147_s12 }
  0x50   : > { %v501_v27 = vpack.c.bf16 %v487_v24, %v486_v23  ;;  %v502_v28 = vpack.c.bf16 %v489_v26, %v488_v25  ;;  %v490_v29 = vld [vmem:[%s2955_s16 + $0x30] sm:$0xff]  ;;  %v491_v30 = vld [vmem:[%s2955_s16 + $0x38] sm:$0xff]  ;;  %v492_v31 = vld [vmem:[%s2955_s16 + $0x40] sm:$0xff] }
  0x51   : > { %2377 = vmatprep.mubr.msk.bf16.mxu0 %vm544_vm0, %v500_v21  ;;  %v493_v32 = vld [vmem:[%s2955_s16 + $0x48] sm:$0xff]  ;;  %v503_v33 = vpack.c.bf16 %v491_v30, %v490_v29  ;;  %v494_v35 = vld [vmem:[%s2955_s16 + $0x50] sm:$0xff]  ;;  %v495_v36 = vld [vmem:[%s2955_s16 + $0x58] sm:$0xff] }
  0x52   : > { %2374 = vmatpush3.bf16.msra.mxu0 %v2669_v18  ;;  %v504_v34 = vpack.c.bf16 %v493_v32, %v492_v31  ;;  %v496_v37 = vld [vmem:[%s2955_s16 + $0x60] sm:$0xff]  ;;  %v497_v38 = vld [vmem:[%s2955_s16 + $0x68] sm:$0xff]  ;;  %v505_v39 = vpack.c.bf16 %v495_v36, %v494_v35  ;;  %v498_v41 = vld [vmem:[%s2955_s16 + $0x70] sm:$0xff] }
  0x53   : > { %2375 = vmatprep.subr.bf16.mxu0 %v2670_v22  ;;  %v506_v40 = vpack.c.bf16 %v497_v38, %v496_v37  ;;  %v499_v42 = vld [vmem:[%s2955_s16 + $0x78] sm:$0xff]  ;;  %v2671_v29 = vld [vmem:[%s3441_s4] sm:$0xff]  }
  0x54   : > { %v507_v43 = vpack.c.bf16 %v499_v42, %v498_v41  ;;  %2393 = vmatprep.subr.bf16.mxu1 %v2671_v29 }
  0x55   : > { %2394 = vmatpush3.bf16.msra.mxu1 %v2671_v29 }
  0x56   : > { %2376 = vmatpush3.bf16.msra.mxu0 %v2670_v22 }
  0x59   : > { %2378 = vmatmul.mubr.msk.bf16.vlgmr.msra.gmra.mrb[0].mxu0 %vm544_vm0, %v501_v27 }
  0x5a   : > { %2381 = vmatprep.mubr.msk.bf16.mxu0 %vm544_vm0, %v502_v28 }
  0x61   : > { %2382 = vmatmul.mubr.msk.bf16.gmra.mrb[4].mxu0 %vm544_vm0, %v503_v33 }
  0x62   : > { %2385 = vmatprep.mubr.msk.bf16.mxu0 %vm544_vm0, %v504_v34 }
  0x69   : > { %2386 = vmatmul.mubr.msk.bf16.gmra.mrb[8].mxu0 %vm544_vm0, %v505_v39 }
  0x6a   : > { %2389 = vmatprep.mubr.msk.bf16.mxu0 %vm544_vm0, %v506_v40 }
  0x71   : > { %2390 = vmatmul.mubr.msk.bf16.gmra.mrb[12].mxu0 %vm544_vm0, %v507_v43 }
 0x12c   : > { %v2379_v45 = vpop.f32.mrb[0].mxu0 }
 0x12d   : > { %v2984_v46 = vadd.f32 %v2379_v45, %v2148_v44  ;;  %v603_v47 = vpop.f32.mrb[1].mxu0 }
 0x12e   : > { %v2986_v48 = vadd.f32 %v2148_v44, %v603_v47  ;;  %v2380_v49 = vpop.f32.mrb[2].mxu0 }
 0x12f   : > { %v668_v50 = vmax.f32 %v2984_v46, 0.0  ;;  %v2989_v51 = vadd.f32 %v2380_v49, %v2148_v44  ;;  %v606_v52 = vpop.f32.mrb[3].mxu0 }
 0x130   : > { %v666_v53 = vmax.f32 %v2986_v48, 0.0  ;;  %v2992_v54 = vadd.f32 %v2148_v44, %v606_v52 }
 0x131   : > { %686 = vadd.xlane.f32.xlu1 %v668_v50  ;;  %v669_v55 = vmax.f32 %v2989_v51, 0.0 }
 0x132   : > { %682 = vadd.xlane.f32.xlu0 %v666_v53  ;;  %v667_v56 = vmax.f32 %v2992_v54, 0.0 }
 0x134   : > { %v2383_v57 = vpop.f32.mrb[4].mxu0 }
 0x135   : > { %688 = vadd.xlane.f32.xlu1 %v669_v55  ;;  %v619_v58 = vpop.f32.mrb[5].mxu0  ;;  %v3006_v62 = vadd.f32 %v2383_v57, %v2148_v44 }
 0x136   : > { %v3002_v59 = vadd.f32 %v2148_v44, %v619_v58  ;;  %v2384_v60 = vpop.f32.mrb[6].mxu0  ;;  %684 = vadd.xlane.f32.xlu0 %v667_v56 }
 0x137   : > { %v622_v61 = vpop.f32.mrb[7].mxu0  ;;  %v3011_v1 = vadd.f32 %v2384_v60, %v2148_v44  ;;  %v672_v3 = vmax.f32 %v3006_v62, 0.0 }
 0x138   : > { %v670_v63 = vmax.f32 %v3002_v59, 0.0  ;;  %v3009_v0 = vadd.f32 %v2148_v44, %v622_v61 }
 0x139   : > { %v673_v6 = vmax.f32 %v3011_v1, 0.0 }
 0x13a   : > { %v671_v2 = vmax.f32 %v3009_v0, 0.0  ;;  %690 = vadd.xlane.f32.xlu0 %v670_v63 }
 0x13c   : > { %v2387_v4 = vpop.f32.mrb[8].mxu0  ;;  %692 = vadd.xlane.f32.xlu1 %v671_v2 }
 0x13d   : > { %v635_v5 = vpop.f32.mrb[9].mxu0  ;;  %v3024_v10 = vadd.f32 %v2387_v4, %v2148_v44 }
 0x13e   : > { %v3020_v7 = vadd.f32 %v2148_v44, %v635_v5  ;;  %v2388_v8 = vpop.f32.mrb[10].mxu0  ;;  %694 = vadd.xlane.f32.xlu0 %v672_v3 }
 0x13f   : > { %v638_v9 = vpop.f32.mrb[11].mxu0  ;;  %v3031_v13 = vadd.f32 %v2388_v8, %v2148_v44  ;;  %v676_v15 = vmax.f32 %v3024_v10, 0.0 }
 0x140   : > { %v674_v11 = vmax.f32 %v3020_v7, 0.0  ;;  %v3027_v12 = vadd.f32 %v2148_v44, %v638_v9  ;;  %696 = vadd.xlane.f32.xlu1 %v673_v6  ;;  %v2672_v7 = vld [vmem:[%s3441_s4 + $0x8] sm:$0xff]  }
 0x141   : > { %v677_v18 = vmax.f32 %v3031_v13, 0.0  ;;  %2395 = vmatprep.subr.bf16.mxu1 %v2672_v7  ;;  %v2673_v13 = vld [vmem:[%s3441_s4 + $0x10] sm:$0xff]  }
 0x142   : > { %v675_v14 = vmax.f32 %v3027_v12, 0.0  ;;  %698 = vadd.xlane.f32.xlu0 %v674_v11  ;;  %2396 = vmatpush3.bf16.msra.mxu1 %v2672_v7 }
 0x143   : > { %2397 = vmatprep.subr.bf16.mxu1 %v2673_v13 }
 0x144   : > { %v2391_v16 = vpop.f32.mrb[12].mxu0  ;;  %700 = vadd.xlane.f32.xlu1 %v675_v14 }
 0x145   : > { %v651_v17 = vpop.f32.mrb[13].mxu0  ;;  %v3044_v22 = vadd.f32 %v2391_v16, %v2148_v44 }
 0x146   : > { %v3040_v19 = vadd.f32 %v2148_v44, %v651_v17  ;;  %v2392_v20 = vpop.f32.mrb[14].mxu0  ;;  %702 = vadd.xlane.f32.xlu0 %v676_v15  ;;  %2398 = vmatpush3.bf16.msra.mxu1 %v2673_v13 }
 0x147   : > { %v654_v21 = vpop.f32.mrb[15].mxu0  ;;  %v3051_v25 = vadd.f32 %v2392_v20, %v2148_v44  ;;  %v680_v27 = vmax.f32 %v3044_v22, 0.0  ;;  %v2675_v22 = vld [vmem:[%s3441_s4 + $0x20] sm:$0xff]  }
 0x148   : > { %v678_v23 = vmax.f32 %v3040_v19, 0.0  ;;  %v3047_v24 = vadd.f32 %v2148_v44, %v654_v21  ;;  %704 = vadd.xlane.f32.xlu1 %v677_v18 }
 0x149   : > { %v681_v28 = vmax.f32 %v3051_v25, 0.0  ;;  %v2676_v25 = vld [vmem:[%s3441_s4 + $0x28] sm:$0xff]  }
 0x14a   : > { %v679_v26 = vmax.f32 %v3047_v24, 0.0  ;;  %706 = vadd.xlane.f32.xlu0 %v678_v23  ;;  %v2674_v24 = vld [vmem:[%s3441_s4 + $0x18] sm:$0xff]  }
 0x14b   : > { %2399 = vmatprep.subr.bf16.mxu1 %v2674_v24 }
 0x14c   : > { %708 = vadd.xlane.f32.xlu1 %v679_v26  ;;  %2400 = vmatpush3.bf16.msra.mxu1 %v2674_v24 }
 0x14d   : > { %2401 = vmatprep.subr.bf16.mxu1 %v2675_v22 }
 0x14e   : > { %710 = vadd.xlane.f32.xlu0 %v680_v27 }
 0x150   : > { %712 = vadd.xlane.f32.xlu1 %v681_v28  ;;  %2402 = vmatpush3.bf16.msra.mxu1 %v2675_v22 }
 0x151   : > { %2403 = vmatprep.subr.bf16.mxu1 %v2676_v25 }
 0x154   : > { %2404 = vmatpush3.bf16.msra.mxu1 %v2676_v25 }
 0x1be   : > { %v687_v30 = vpop.xlane.xlu1 %686 }
 0x1bf   : > { %v683_v31 = vpop.xlane.xlu0 %682  ;;  %v717_v32 = vmul.f32 0.0078125, %v687_v30 }
 0x1c0   : > { %v715_v33 = vmul.f32 0.0078125, %v683_v31 }
 0x1c1   : > { %v3073_v37 = vsub.f32 %v668_v50, %v717_v32 }
 0x1c2   : > { %v3069_v34 = vsub.f32 %v666_v53, %v715_v33  ;;  %v689_v35 = vpop.xlane.xlu1 %688 }
 0x1c3   : > { %v685_v36 = vpop.xlane.xlu0 %684  ;;  %v718_v38 = vmul.f32 0.0078125, %v689_v35  ;;  %v749_v45 = vmul.f32 %v3073_v37, %v3073_v37 }
 0x1c4   : > { %v716_v39 = vmul.f32 0.0078125, %v685_v36  ;;  %v747_v40 = vmul.f32 %v3069_v34, %v3069_v34 }
 0x1c5   : > { %v3083_v43 = vsub.f32 %v669_v55, %v718_v38  ;;  %v2678_v38 = vld [vmem:[%s3441_s4 + $0x38] sm:$0xff]  }
 0x1c6   : > { %v3079_v41 = vsub.f32 %v667_v56, %v716_v39  ;;  %763 = vadd.xlane.f32.xlu0 %v747_v40 }
 0x1c7   : > { %v691_v42 = vpop.xlane.xlu0 %690  ;;  %v750_v53 = vmul.f32 %v3083_v43, %v3083_v43 }
 0x1c8   : > { %v719_v44 = vmul.f32 0.0078125, %v691_v42  ;;  %v748_v46 = vmul.f32 %v3079_v41, %v3079_v41 }
 0x1c9   : > { %v693_v47 = vpop.xlane.xlu1 %692 }
 0x1ca   : > { %v3091_v48 = vsub.f32 %v670_v63, %v719_v44  ;;  %v720_v49 = vmul.f32 0.0078125, %v693_v47  ;;  %767 = vadd.xlane.f32.xlu0 %v749_v45  ;;  %765 = vadd.xlane.f32.xlu1 %v748_v46 }
 0x1cb   : > { %v695_v50 = vpop.xlane.xlu0 %694 }
 0x1cc   : > { %v3095_v51 = vsub.f32 %v671_v2, %v720_v49  ;;  %v721_v52 = vmul.f32 0.0078125, %v695_v50  ;;  %v751_v54 = vmul.f32 %v3091_v48, %v3091_v48 }
 0x1cd   : > { %v697_v55 = vpop.xlane.xlu1 %696 }
 0x1ce   : > { %v3103_v56 = vsub.f32 %v672_v3, %v721_v52  ;;  %v722_v57 = vmul.f32 0.0078125, %v697_v55  ;;  %769 = vadd.xlane.f32.xlu1 %v750_v53  ;;  %771 = vadd.xlane.f32.xlu0 %v751_v54  ;;  %v752_v61 = vmul.f32 %v3095_v51, %v3095_v51 }
 0x1cf   : > { %v699_v58 = vpop.xlane.xlu0 %698 }
 0x1d0   : > { %v3107_v59 = vsub.f32 %v673_v6, %v722_v57  ;;  %v723_v60 = vmul.f32 0.0078125, %v699_v58  ;;  %v753_v63 = vmul.f32 %v3103_v56, %v3103_v56 }
 0x1d1   : > { %v701_v0 = vpop.xlane.xlu1 %700 }
 0x1d2   : > { %v3115_v62 = vsub.f32 %v674_v11, %v723_v60  ;;  %v724_v2 = vmul.f32 0.0078125, %v701_v0  ;;  %773 = vadd.xlane.f32.xlu1 %v752_v61  ;;  %775 = vadd.xlane.f32.xlu0 %v753_v63  ;;  %v754_v5 = vmul.f32 %v3107_v59, %v3107_v59 }
 0x1d3   : > { %v703_v3 = vpop.xlane.xlu0 %702 }
 0x1d4   : > { %v3119_v1 = vsub.f32 %v675_v14, %v724_v2  ;;  %v725_v4 = vmul.f32 0.0078125, %v703_v3  ;;  %v755_v6 = vmul.f32 %v3115_v62, %v3115_v62 }
 0x1d5   : > { %v705_v8 = vpop.xlane.xlu1 %704 }
 0x1d6   : > { %v3130_v9 = vsub.f32 %v676_v15, %v725_v4  ;;  %v726_v11 = vmul.f32 0.0078125, %v705_v8  ;;  %777 = vadd.xlane.f32.xlu1 %v754_v5  ;;  %779 = vadd.xlane.f32.xlu0 %v755_v6  ;;  %v756_v17 = vmul.f32 %v3119_v1, %v3119_v1 }
 0x1d7   : > { %v707_v12 = vpop.xlane.xlu0 %706 }
 0x1d8   : > { %v3134_v14 = vsub.f32 %v677_v18, %v726_v11  ;;  %v727_v16 = vmul.f32 0.0078125, %v707_v12  ;;  %v757_v20 = vmul.f32 %v3130_v9, %v3130_v9  ;;  %v3188_v12 = vld [vmem:[%s3444_s7 + $0x1] ss:$0 sm:$0xff] }
 0x1d9   : > { %v709_v10 = vpop.xlane.xlu1 %708 }
 0x1da   : > { %v3142_v15 = vsub.f32 %v678_v23, %v727_v16  ;;  %v728_v21 = vmul.f32 0.0078125, %v709_v10  ;;  %781 = vadd.xlane.f32.xlu1 %v756_v17  ;;  %783 = vadd.xlane.f32.xlu0 %v757_v20  ;;  %v758_v31 = vmul.f32 %v3134_v14, %v3134_v14 }
 0x1db   : > { %v711_v18 = vpop.xlane.xlu0 %710 }
 0x1dc   : > { %v3149_v29 = vsub.f32 %v679_v26, %v728_v21  ;;  %v729_v30 = vmul.f32 0.0078125, %v711_v18  ;;  %v759_v19 = vmul.f32 %v3142_v15, %v3142_v15 }
 0x1dd   : > { %v713_v23 = vpop.xlane.xlu1 %712 }
 0x1de   : > { %v3157_v32 = vsub.f32 %v680_v27, %v729_v30  ;;  %v730_v33 = vmul.f32 0.0078125, %v713_v23  ;;  %785 = vadd.xlane.f32.xlu1 %v758_v31  ;;  %787 = vadd.xlane.f32.xlu0 %v759_v19  ;;  %v760_v35 = vmul.f32 %v3149_v29, %v3149_v29  ;;  %v3195_v19 = vld [vmem:[%s3444_s7 + $0x2] ss:$0 sm:$0xff] }
 0x1e0   : > { %v3164_v26 = vsub.f32 %v681_v28, %v730_v33  ;;  %v761_v36 = vmul.f32 %v3157_v32, %v3157_v32  ;;  %v2677_v28 = vld [vmem:[%s3441_s4 + $0x30] sm:$0xff]  }
 0x1e1   : > { %2405 = vmatprep.subr.bf16.mxu1 %v2677_v28 }
 0x1e2   : > { %789 = vadd.xlane.f32.xlu1 %v760_v35  ;;  %791 = vadd.xlane.f32.xlu0 %v761_v36  ;;  %v762_v27 = vmul.f32 %v3164_v26, %v3164_v26 }
 0x1e3   : > { %2406 = vmatpush3.bf16.msra.mxu1 %v2677_v28 }
 0x1e4   : > { %2407 = vmatprep.subr.bf16.mxu1 %v2678_v38 }
 0x1e6   : > { %793 = vadd.xlane.f32.xlu1 %v762_v27 }
 0x1e7   : > { %2408 = vmatpush3.bf16.msra.mxu1 %v2678_v38 }
 0x253   : > { %v764_v39 = vpop.xlane.xlu0 %763 }
 0x254   : > { %v795_v40 = vmul.f32 0.0078125, %v764_v39 }
 0x256   : > { %v811_v42 = vadd.f32 1e-05, %v795_v40 }
 0x257   : > { %v766_v44 = vpop.xlane.xlu1 %765  ;;  %v768_v45 = vpop.xlane.xlu0 %767 }
 0x258   : > { %2711 = vrsqrt.f32 %v811_v42  ;;  %v796_v46 = vmul.f32 0.0078125, %v766_v44  ;;  %v797_v47 = vmul.f32 0.0078125, %v768_v45 }
 0x25a   : > { %v812_v49 = vadd.f32 1e-05, %v796_v46  ;;  %v813_v50 = vadd.f32 1e-05, %v797_v47 }
 0x25b   : > { %v770_v52 = vpop.xlane.xlu1 %769  ;;  %v772_v53 = vpop.xlane.xlu0 %771 }
 0x25c   : > { %2713 = vrsqrt.f32 %v812_v49  ;;  %v798_v54 = vmul.f32 0.0078125, %v770_v52  ;;  %v799_v55 = vmul.f32 0.0078125, %v772_v53 }
 0x25d   : > { %2715 = vrsqrt.f32 %v813_v50 }
 0x25e   : > { %v814_v57 = vadd.f32 1e-05, %v798_v54  ;;  %v815_v58 = vadd.f32 1e-05, %v799_v55 }
 0x25f   : > { %v774_v60 = vpop.xlane.xlu1 %773  ;;  %v776_v61 = vpop.xlane.xlu0 %775 }
 0x260   : > { %2717 = vrsqrt.f32 %v814_v57  ;;  %v800_v63 = vmul.f32 0.0078125, %v774_v60  ;;  %v801_v0 = vmul.f32 0.0078125, %v776_v61 }
 0x261   : > { %2719 = vrsqrt.f32 %v815_v58 }
 0x262   : > { %v2712_v2 = vpop.eup %2711  ;;  %v816_v3 = vadd.f32 1e-05, %v800_v63  ;;  %v817_v4 = vadd.f32 1e-05, %v801_v0 }
 0x263   : > { %v778_v5 = vpop.xlane.xlu1 %777  ;;  %v780_v6 = vpop.xlane.xlu0 %779  ;;  %v843_v8 = vmul.f32 %v2712_v2, %v3069_v34 }
 0x264   : > { %2721 = vrsqrt.f32 %v816_v3  ;;  %v802_v7 = vmul.f32 0.0078125, %v778_v5  ;;  %v803_v11 = vmul.f32 0.0078125, %v780_v6 }
 0x265   : > { %2723 = vrsqrt.f32 %v817_v4  ;;  %v863_v30 = vmul.f32 %v3188_v12, %v843_v8 }
 0x266   : > { %v2714_v16 = vpop.eup %2713  ;;  %v818_v17 = vadd.f32 1e-05, %v802_v7  ;;  %v819_v20 = vadd.f32 1e-05, %v803_v11 }
 0x267   : > { %v2716_v10 = vpop.eup %2715  ;;  %v782_v21 = vpop.xlane.xlu1 %781  ;;  %v844_v18 = vmul.f32 %v2714_v16, %v3079_v41  ;;  %v883_v25 = vadd.f32 %v3195_v19, %v863_v30 }
 0x268   : > { %v784_v13 = vpop.xlane.xlu0 %783  ;;  %2725 = vrsqrt.f32 %v818_v17  ;;  %v804_v34 = vmul.f32 0.0078125, %v782_v21  ;;  %v845_v23 = vmul.f32 %v2716_v10, %v3073_v37 }
 0x269   : > { %v805_v31 = vmul.f32 0.0078125, %v784_v13  ;;  %2727 = vrsqrt.f32 %v819_v20  ;;  %v864_v33 = vmul.f32 %v3188_v12, %v844_v18 }
 0x26a   : > { %v2718_v24 = vpop.eup %2717  ;;  %v820_v35 = vadd.f32 1e-05, %v804_v34  ;;  %v865_v39 = vmul.f32 %v3188_v12, %v845_v23 }
 0x26b   : > { %v821_v36 = vadd.f32 1e-05, %v805_v31  ;;  %v2720_v22 = vpop.eup %2719  ;;  %v786_v41 = vpop.xlane.xlu1 %785  ;;  %v884_v28 = vadd.f32 %v3195_v19, %v864_v33  ;;  %v846_v38 = vmul.f32 %v2718_v24, %v3083_v43 }
 0x26c   : > { %v788_v27 = vpop.xlane.xlu0 %787  ;;  %2729 = vrsqrt.f32 %v820_v35  ;;  %v806_v40 = vmul.f32 0.0078125, %v786_v41  ;;  %v847_v45 = vmul.f32 %v2720_v22, %v3091_v48  ;;  %v885_v43 = vadd.f32 %v3195_v19, %v865_v39 }
 0x26d   : > { %v807_v37 = vmul.f32 0.0078125, %v788_v27  ;;  %2731 = vrsqrt.f32 %v821_v36  ;;  %v932_v42 = vpack.c.bf16 %v884_v28, %v883_v25  ;;  %v866_v44 = vmul.f32 %v3188_v12, %v846_v38 }
 0x26e   : > { %v2722_v46 = vpop.eup %2721  ;;  %v822_v47 = vadd.f32 1e-05, %v806_v40  ;;  %v867_v57 = vmul.f32 %v3188_v12, %v847_v45 }
 0x26f   : > { %v823_v49 = vadd.f32 1e-05, %v807_v37  ;;  %v2724_v50 = vpop.eup %2723  ;;  %v790_v52 = vpop.xlane.xlu1 %789  ;;  %2409 = vmatprep.mubr.bf16.mxu1 %v932_v42  ;;  %v886_v54 = vadd.f32 %v3195_v19, %v866_v44  ;;  %v848_v55 = vmul.f32 %v2722_v46, %v3095_v51 }
 0x270   : > { %v792_v53 = vpop.xlane.xlu0 %791  ;;  %2733 = vrsqrt.f32 %v822_v47  ;;  %v808_v58 = vmul.f32 0.0078125, %v790_v52  ;;  %v849_v48 = vmul.f32 %v2724_v50, %v3103_v56  ;;  %v887_v6 = vadd.f32 %v3195_v19, %v867_v57 }
 0x271   : > { %v809_v60 = vmul.f32 0.0078125, %v792_v53  ;;  %2735 = vrsqrt.f32 %v823_v49  ;;  %v933_v61 = vpack.c.bf16 %v886_v54, %v885_v43  ;;  %v868_v63 = vmul.f32 %v3188_v12, %v848_v55  ;;  %v3243_v53 = vld [vmem:[%s2945_s26] sm:$0xff]   ;;  %v2688_v43 = vld [vmem:[%s3441_s4 + $0x48] sm:$0xff]  }
 0x272   : > { %v2726_v0 = vpop.eup %2725  ;;  %v824_v2 = vadd.f32 1e-05, %v808_v58  ;;  %v869_v7 = vmul.f32 %v3188_v12, %v849_v48  ;;  %2441 = vmatprep.mubr.bf16.mxu0 %v3243_v53  ;;  %v2691_v54 = vld [vmem:[%s3441_s4 + $0x60] sm:$0xff]   ;;  %v2692_v55 = vld [vmem:[%s3441_s4 + $0x68] sm:$0xff]  }
 0x273   : > { %v825_v3 = vadd.f32 1e-05, %v809_v60  ;;  %v2728_v4 = vpop.eup %2727  ;;  %v794_v5 = vpop.xlane.xlu1 %793  ;;  %2410 = vmatmul.mubr.bf16.vlgmr.msra.gmra.mrb[0].mxu1 %v933_v61  ;;  %v888_v51 = vadd.f32 %v3195_v19, %v868_v63  ;;  %v850_v8 = vmul.f32 %v2726_v0, %v3107_v59 }
 0x274   : > { %2737 = vrsqrt.f32 %v824_v2  ;;  %v810_v56 = vmul.f32 0.0078125, %v794_v5  ;;  %v851_v11 = vmul.f32 %v2728_v4, %v3115_v62  ;;  %v889_v13 = vadd.f32 %v3195_v19, %v869_v7 }
 0x275   : > { %2739 = vrsqrt.f32 %v825_v3  ;;  %v934_v16 = vpack.c.bf16 %v888_v51, %v887_v6  ;;  %v870_v17 = vmul.f32 %v3188_v12, %v850_v8 }
 0x276   : > { %v2730_v20 = vpop.eup %2729  ;;  %v826_v10 = vadd.f32 1e-05, %v810_v56  ;;  %v871_v30 = vmul.f32 %v3188_v12, %v851_v11 }
 0x277   : > { %v2732_v21 = vpop.eup %2731  ;;  %2413 = vmatprep.mubr.bf16.mxu1 %v934_v16  ;;  %v890_v18 = vadd.f32 %v3195_v19, %v870_v17  ;;  %v852_v59 = vmul.f32 %v2730_v20, %v3119_v1 }
 0x278   : > { %2741 = vrsqrt.f32 %v826_v10  ;;  %v853_v34 = vmul.f32 %v2732_v21, %v3130_v9  ;;  %v891_v24 = vadd.f32 %v3195_v19, %v871_v30  ;;  %v3268_v30 = vld [vmem:[%s2945_s26 + $0x10] sm:$0xff]  }
 0x279   : > { %v935_v62 = vpack.c.bf16 %v890_v18, %v889_v13  ;;  %v872_v31 = vmul.f32 %v3188_v12, %v852_v59  ;;  %v3265_v59 = vld [vmem:[%s2945_s26 + $0x8] sm:$0xff]  }
 0x27a   : > { %v2734_v23 = vpop.eup %2733  ;;  %v873_v22 = vmul.f32 %v3188_v12, %v853_v34  ;;  %v3273_v34 = vld [vmem:[%s2945_s26 + $0x18] sm:$0xff]  }
 0x27b   : > { %v2736_v33 = vpop.eup %2735  ;;  %2414 = vmatmul.mubr.bf16.gmra.mrb[4].mxu1 %v935_v62  ;;  %v892_v35 = vadd.f32 %v3195_v19, %v872_v31  ;;  %v854_v36 = vmul.f32 %v2734_v23, %v3134_v14  ;;  %v3276_v62 = vld [vmem:[%s2945_s26 + $0x20] sm:$0xff]   ;;  %v3281_v31 = vld [vmem:[%s2945_s26 + $0x28] sm:$0xff]   ;;  %v3284_v23 = vld [vmem:[%s2945_s26 + $0x30] sm:$0xff]  }
 0x27c   : > { %v855_v1 = vmul.f32 %v2736_v33, %v3142_v15  ;;  %v893_v28 = vadd.f32 %v3195_v19, %v873_v22  ;;  %v3289_v33 = vld [vmem:[%s2945_s26 + $0x38] sm:$0xff]   ;;  %s2146_s26 = sshll.u32 %s472_s23, 3 }
 0x27d   : > { %v936_v41 = vpack.c.bf16 %v892_v35, %v891_v24  ;;  %v874_v27 = vmul.f32 %v3188_v12, %v854_v36  ;;  %v2693_v24 = vld [vmem:[%s3441_s4 + $0x70] sm:$0xff]   ;;  %v2694_v35 = vld [vmem:[%s3441_s4 + $0x78] sm:$0xff]   ;;  %v2171_v36 = vld [vmem:[%s3444_s7 + $0x3] ss:$0 sm:$0xff]  ;;  %s474_s25 = scalar_lea.vmem %s3439_s2, %s2146_s26 }
 0x27e   : > { %v2738_v9 = vpop.eup %2737  ;;  %v875_v40 = vmul.f32 %v3188_v12, %v855_v1 }
 0x27f   : > { %v2740_v25 = vpop.eup %2739  ;;  %2417 = vmatprep.mubr.bf16.mxu1 %v936_v41  ;;  %v894_v38 = vadd.f32 %v3195_v19, %v874_v27  ;;  %v856_v39 = vmul.f32 %v2738_v9, %v3149_v29 }
 0x280   : > { %v857_v14 = vmul.f32 %v2740_v25, %v3157_v32  ;;  %v895_v44 = vadd.f32 %v3195_v19, %v875_v40 }
 0x281   : > { %v937_v37 = vpack.c.bf16 %v894_v38, %v893_v28  ;;  %v876_v15 = vmul.f32 %v3188_v12, %v856_v39 }
 0x282   : > { %v2742_v42 = vpop.eup %2741  ;;  %v877_v47 = vmul.f32 %v3188_v12, %v857_v14 }
 0x283   : > { %2418 = vmatmul.mubr.bf16.gmra.mrb[8].mxu1 %v937_v37  ;;  %v896_v45 = vadd.f32 %v3195_v19, %v876_v15  ;;  %v858_v46 = vmul.f32 %v2742_v42, %v3164_v26  ;;  %v2687_v26 = vld [vmem:[%s3441_s4 + $0x40] sm:$0xff]  }
 0x284   : > { %v897_v32 = vadd.f32 %v3195_v19, %v877_v47  ;;  %2457 = vmatprep.subr.bf16.mxu1 %v2687_v26 }
 0x285   : > { %v938_v49 = vpack.c.bf16 %v896_v45, %v895_v44  ;;  %v878_v29 = vmul.f32 %v3188_v12, %v858_v46  ;;  %2458 = vmatpush3.bf16.msra.mxu1 %v2687_v26  ;;  %v2689_v12 = vld [vmem:[%s3441_s4 + $0x50] sm:$0xff]  }
 0x286   : > { %2459 = vmatprep.subr.bf16.mxu1 %v2688_v43 }
 0x287   : > { %2421 = vmatprep.mubr.bf16.mxu1 %v938_v49  ;;  %v898_v50 = vadd.f32 %v3195_v19, %v878_v29  ;;  %v2690_v19 = vld [vmem:[%s3441_s4 + $0x58] sm:$0xff]  }
 0x289   : > { %v939_v52 = vpack.c.bf16 %v898_v50, %v897_v32  ;;  %2460 = vmatpush3.bf16.msra.mxu1 %v2688_v43 }
 0x28a   : > { %2461 = vmatprep.subr.bf16.mxu1 %v2689_v12 }
 0x28b   : > { %2422 = vmatmul.mubr.bf16.gmra.mrb[12].mxu1 %v939_v52 }
 0x28d   : > { %2462 = vmatpush3.bf16.msra.mxu1 %v2689_v12 }
 0x28e   : > { %2463 = vmatprep.subr.bf16.mxu1 %v2690_v19 }
 0x291   : > { %2464 = vmatpush3.bf16.msra.mxu1 %v2690_v19 }
 0x292   : > { %2465 = vmatprep.subr.bf16.mxu1 %v2691_v54 }
 0x295   : > { %2466 = vmatpush3.bf16.msra.mxu1 %v2691_v54 }
 0x296   : > { %2467 = vmatprep.subr.bf16.mxu1 %v2692_v55 }
 0x299   : > { %2468 = vmatpush3.bf16.msra.mxu1 %v2692_v55 }
 0x29a   : > { %2469 = vmatprep.subr.bf16.mxu1 %v2693_v24 }
 0x29d   : > { %2470 = vmatpush3.bf16.msra.mxu1 %v2693_v24 }
 0x29e   : > { %2471 = vmatprep.subr.bf16.mxu1 %v2694_v35 }
 0x2a1   : > { %2472 = vmatpush3.bf16.msra.mxu1 %v2694_v35 }
 0x346   : > { %v2411_v57 = vpop.f32.mrb[0].mxu1 }
 0x347   : > { %v1022_v58 = vpop.f32.mrb[1].mxu1 }
 0x348   : > { %v2412_v60 = vpop.f32.mrb[2].mxu1 }
 0x349   : > { %v1086_v48 = vpack.c.bf16 %v2412_v60, %v2411_v57  ;;  %v1025_v61 = vpop.f32.mrb[3].mxu1 }
 0x34a   : > { %v1085_v63 = vpack.c.bf16 %v1025_v61, %v1022_v58 }
 0x34c   : > { %2425 = vmatprep.subr.bf16.mxu0 %v1085_v63 }
 0x34d   : > { %2426 = vmatpush3.bf16.msra.mxu0 %v1085_v63 }
 0x34e   : > { %v2415_v0 = vpop.f32.mrb[4].mxu1  ;;  %2427 = vmatprep.subr.bf16.mxu0 %v1086_v48 }
 0x34f   : > { %v1038_v2 = vpop.f32.mrb[5].mxu1 }
 0x350   : > { %v2416_v3 = vpop.f32.mrb[6].mxu1 }
 0x351   : > { %v1088_v4 = vpack.c.bf16 %v2416_v3, %v2415_v0  ;;  %v1041_v5 = vpop.f32.mrb[7].mxu1  ;;  %2428 = vmatpush3.bf16.msra.mxu0 %v1086_v48 }
 0x352   : > { %v1087_v6 = vpack.c.bf16 %v1041_v5, %v1038_v2 }
 0x354   : > { %2429 = vmatprep.subr.bf16.mxu0 %v1087_v6 }
 0x355   : > { %2430 = vmatpush3.bf16.msra.mxu0 %v1087_v6 }
 0x356   : > { %v2419_v51 = vpop.f32.mrb[8].mxu1  ;;  %2431 = vmatprep.subr.bf16.mxu0 %v1088_v4 }
 0x357   : > { %v1054_v8 = vpop.f32.mrb[9].mxu1 }
 0x358   : > { %v2420_v7 = vpop.f32.mrb[10].mxu1 }
 0x359   : > { %v1090_v56 = vpack.c.bf16 %v2420_v7, %v2419_v51  ;;  %v1057_v11 = vpop.f32.mrb[11].mxu1  ;;  %2432 = vmatpush3.bf16.msra.mxu0 %v1088_v4 }
 0x35a   : > { %v1089_v16 = vpack.c.bf16 %v1057_v11, %v1054_v8 }
 0x35c   : > { %2433 = vmatprep.subr.bf16.mxu0 %v1089_v16 }
 0x35d   : > { %2434 = vmatpush3.bf16.msra.mxu0 %v1089_v16 }
 0x35e   : > { %v2423_v17 = vpop.f32.mrb[12].mxu1  ;;  %2435 = vmatprep.subr.bf16.mxu0 %v1090_v56 }
 0x35f   : > { %v1070_v20 = vpop.f32.mrb[13].mxu1 }
 0x360   : > { %v2424_v10 = vpop.f32.mrb[14].mxu1 }
 0x361   : > { %v1092_v21 = vpack.c.bf16 %v2424_v10, %v2423_v17  ;;  %v1073_v13 = vpop.f32.mrb[15].mxu1  ;;  %2436 = vmatpush3.bf16.msra.mxu0 %v1090_v56 }
 0x362   : > { %v1091_v18 = vpack.c.bf16 %v1073_v13, %v1070_v20 }
 0x364   : > { %2437 = vmatprep.subr.bf16.mxu0 %v1091_v18 }
 0x365   : > { %2438 = vmatpush3.bf16.msra.mxu0 %v1091_v18 }
 0x366   : > { %2439 = vmatprep.subr.bf16.mxu0 %v1092_v21 }
 0x369   : > { %2440 = vmatpush3.bf16.msra.mxu0 %v1092_v21 }
 0x36c   : > { %2442 = vmatmul.mubr.bf16.vlgmr.msra.gmra.mrb[16].mxu0 %v3265_v59 }
 0x36d   : > { %2445 = vmatprep.mubr.bf16.mxu0 %v3268_v30 }
 0x374   : > { %2446 = vmatmul.mubr.bf16.gmra.mrb[20].mxu0 %v3273_v34 }
 0x375   : > { %2449 = vmatprep.mubr.bf16.mxu0 %v3276_v62 }
 0x37c   : > { %2450 = vmatmul.mubr.bf16.gmra.mrb[24].mxu0 %v3281_v31 }
 0x37d   : > { %2453 = vmatprep.mubr.bf16.mxu0 %v3284_v23 }
 0x384   : > { %2454 = vmatmul.mubr.bf16.gmra.mrb[28].mxu0 %v3289_v33 }
 0x385   : > { %2505 = vmatprep.mubr.bf16.mxu0 %v3243_v53 }
 0x43f   : > { %v2443_v22 = vpop.f32.mrb[16].mxu0 }
 0x440   : > { %v1188_v1 = vadd.f32 %v2443_v22, %v2171_v36  ;;  %v1179_v41 = vpop.f32.mrb[17].mxu0 }
 0x441   : > { %v1180_v27 = vadd.f32 %v2171_v36, %v1179_v41  ;;  %v2444_v9 = vpop.f32.mrb[18].mxu0  ;;  %v2696_v41 = vld [vmem:[%s3441_s4 + $0x88] sm:$0xff]  }
 0x442   : > { %v1191_v25 = vadd.f32 %v2444_v9, %v2171_v36  ;;  %v1182_v28 = vpop.f32.mrb[19].mxu0  ;;  %v1244_v39 = vmax.f32 %v1188_v1, 0.0  ;;  %v2695_v1 = vld [vmem:[%s3441_s4 + $0x80] sm:$0xff]  }
 0x443   : > { %v1183_v38 = vadd.f32 %v2171_v36, %v1182_v28  ;;  %v1242_v14 = vmax.f32 %v1180_v27, 0.0  ;;  %2521 = vmatprep.subr.bf16.mxu1 %v2695_v1  ;;  %v2698_v27 = vld [vmem:[%s3441_s4 + $0x98] sm:$0xff]   ;;  %v2699_v9 = vld [vmem:[%s3441_s4 + $0xa0] sm:$0xff]  }
 0x444   : > { %v1245_v40 = vmax.f32 %v1191_v25, 0.0  ;;  %v2700_v25 = vld [vmem:[%s3441_s4 + $0xa8] sm:$0xff]  }
 0x445   : > { %v1243_v37 = vmax.f32 %v1183_v38, 0.0 }
 0x446   : > { %v1277_v15 = vpack.c.bf16 %v1245_v40, %v1244_v39 }
 0x447   : > { %v1276_v42 = vpack.c.bf16 %v1243_v37, %v1242_v14  ;;  %v2447_v44 = vpop.f32.mrb[20].mxu0 }
 0x448   : > { %v1204_v45 = vadd.f32 %v2447_v44, %v2171_v36  ;;  %v1195_v46 = vpop.f32.mrb[21].mxu0 }
 0x449   : > { %v1196_v47 = vadd.f32 %v2171_v36, %v1195_v46  ;;  %v2448_v49 = vpop.f32.mrb[22].mxu0  ;;  %2473 = vmatprep.mubr.bf16.mxu1 %v1276_v42 }
 0x44a   : > { %v1207_v29 = vadd.f32 %v2448_v49, %v2171_v36  ;;  %v1198_v32 = vpop.f32.mrb[23].mxu0  ;;  %2474 = vmatmul.mubr.bf16.vlgmr.msra.gmra.mrb[16].mxu1 %v1277_v15  ;;  %v1248_v52 = vmax.f32 %v1204_v45, 0.0 }
 0x44b   : > { %v1199_v50 = vadd.f32 %v2171_v36, %v1198_v32  ;;  %v1246_v43 = vmax.f32 %v1196_v47, 0.0  ;;  %2522 = vmatpush3.bf16.msra.mxu1 %v2695_v1 }
 0x44c   : > { %v1249_v26 = vmax.f32 %v1207_v29, 0.0  ;;  %2523 = vmatprep.subr.bf16.mxu1 %v2696_v41 }
 0x44d   : > { %v1247_v12 = vmax.f32 %v1199_v50, 0.0 }
 0x44e   : > { %v1279_v19 = vpack.c.bf16 %v1249_v26, %v1248_v52 }
 0x44f   : > { %v1278_v54 = vpack.c.bf16 %v1247_v12, %v1246_v43  ;;  %v2451_v55 = vpop.f32.mrb[24].mxu0  ;;  %2524 = vmatpush3.bf16.msra.mxu1 %v2696_v41 }
 0x450   : > { %v1220_v57 = vadd.f32 %v2451_v55, %v2171_v36  ;;  %v1211_v58 = vpop.f32.mrb[25].mxu0 }
 0x451   : > { %v1212_v60 = vadd.f32 %v2171_v36, %v1211_v58  ;;  %v2452_v48 = vpop.f32.mrb[26].mxu0  ;;  %2477 = vmatprep.mubr.bf16.mxu1 %v1278_v54  ;;  %v2701_v58 = vld [vmem:[%s3441_s4 + $0xb0] sm:$0xff]  }
 0x452   : > { %v1223_v61 = vadd.f32 %v2452_v48, %v2171_v36  ;;  %v1214_v63 = vpop.f32.mrb[27].mxu0  ;;  %2478 = vmatmul.mubr.bf16.gmra.mrb[20].mxu1 %v1279_v19  ;;  %v1252_v2 = vmax.f32 %v1220_v57, 0.0  ;;  %v2204_v48 = vld [vmem:[%s3444_s7 + $0x4] ss:$0 sm:$0xff] }
 0x453   : > { %v1215_v0 = vadd.f32 %v2171_v36, %v1214_v63  ;;  %v1250_v4 = vmax.f32 %v1212_v60, 0.0  ;;  %v2702_v60 = vld [vmem:[%s3441_s4 + $0xb8] sm:$0xff]  }
 0x454   : > { %v1253_v3 = vmax.f32 %v1223_v61, 0.0 }
 0x455   : > { %v1251_v5 = vmax.f32 %v1215_v0, 0.0 }
 0x456   : > { %v1281_v6 = vpack.c.bf16 %v1253_v3, %v1252_v2 }
 0x457   : > { %v1280_v51 = vpack.c.bf16 %v1251_v5, %v1250_v4  ;;  %v2455_v8 = vpop.f32.mrb[28].mxu0 }
 0x458   : > { %v1236_v7 = vadd.f32 %v2455_v8, %v2171_v36  ;;  %v1227_v56 = vpop.f32.mrb[29].mxu0 }
 0x459   : > { %v1228_v11 = vadd.f32 %v2171_v36, %v1227_v56  ;;  %v2456_v16 = vpop.f32.mrb[30].mxu0  ;;  %2481 = vmatprep.mubr.bf16.mxu1 %v1280_v51 }
 0x45a   : > { %v1239_v17 = vadd.f32 %v2456_v16, %v2171_v36  ;;  %v1230_v20 = vpop.f32.mrb[31].mxu0  ;;  %2482 = vmatmul.mubr.bf16.gmra.mrb[24].mxu1 %v1281_v6  ;;  %v1256_v21 = vmax.f32 %v1236_v7, 0.0 }
 0x45b   : > { %v1231_v10 = vadd.f32 %v2171_v36, %v1230_v20  ;;  %v1254_v18 = vmax.f32 %v1228_v11, 0.0  ;;  %v2697_v36 = vld [vmem:[%s3441_s4 + $0x90] sm:$0xff]  }
 0x45c   : > { %v1257_v13 = vmax.f32 %v1239_v17, 0.0  ;;  %2525 = vmatprep.subr.bf16.mxu1 %v2697_v36 }
 0x45d   : > { %v1255_v24 = vmax.f32 %v1231_v10, 0.0  ;;  %2526 = vmatpush3.bf16.msra.mxu1 %v2697_v36 }
 0x45e   : > { %v1283_v35 = vpack.c.bf16 %v1257_v13, %v1256_v21  ;;  %2527 = vmatprep.subr.bf16.mxu1 %v2698_v27 }
 0x45f   : > { %v1282_v22 = vpack.c.bf16 %v1255_v24, %v1254_v18 }
 0x461   : > { %2485 = vmatprep.mubr.bf16.mxu1 %v1282_v22  ;;  %2528 = vmatpush3.bf16.msra.mxu1 %v2698_v27 }
 0x462   : > { %2486 = vmatmul.mubr.bf16.gmra.mrb[28].mxu1 %v1283_v35  ;;  %2529 = vmatprep.subr.bf16.mxu1 %v2699_v9 }
 0x465   : > { %2530 = vmatpush3.bf16.msra.mxu1 %v2699_v9 }
 0x466   : > { %2531 = vmatprep.subr.bf16.mxu1 %v2700_v25 }
 0x469   : > { %2532 = vmatpush3.bf16.msra.mxu1 %v2700_v25 }
 0x46a   : > { %2533 = vmatprep.subr.bf16.mxu1 %v2701_v58 }
 0x46d   : > { %2534 = vmatpush3.bf16.msra.mxu1 %v2701_v58 }
 0x46e   : > { %2535 = vmatprep.subr.bf16.mxu1 %v2702_v60 }
 0x471   : > { %2536 = vmatpush3.bf16.msra.mxu1 %v2702_v60 }
 0x51d   : > { %v2475_v28 = vpop.f32.mrb[16].mxu1 }
 0x51e   : > { %v1366_v38 = vpop.f32.mrb[17].mxu1 }
 0x51f   : > { %v2476_v39 = vpop.f32.mrb[18].mxu1 }
 0x520   : > { %v1430_v40 = vpack.c.bf16 %v2476_v39, %v2475_v28  ;;  %v1369_v14 = vpop.f32.mrb[19].mxu1 }
 0x521   : > { %v1429_v37 = vpack.c.bf16 %v1369_v14, %v1366_v38 }
 0x523   : > { %2489 = vmatprep.subr.bf16.mxu0 %v1429_v37 }
 0x524   : > { %2490 = vmatpush3.bf16.msra.mxu0 %v1429_v37 }
 0x525   : > { %v2479_v15 = vpop.f32.mrb[20].mxu1  ;;  %2491 = vmatprep.subr.bf16.mxu0 %v1430_v40 }
 0x526   : > { %v1382_v42 = vpop.f32.mrb[21].mxu1 }
 0x527   : > { %v2480_v44 = vpop.f32.mrb[22].mxu1 }
 0x528   : > { %v1432_v45 = vpack.c.bf16 %v2480_v44, %v2479_v15  ;;  %v1385_v46 = vpop.f32.mrb[23].mxu1  ;;  %2492 = vmatpush3.bf16.msra.mxu0 %v1430_v40 }
 0x529   : > { %v1431_v47 = vpack.c.bf16 %v1385_v46, %v1382_v42 }
 0x52b   : > { %2493 = vmatprep.subr.bf16.mxu0 %v1431_v47 }
 0x52c   : > { %2494 = vmatpush3.bf16.msra.mxu0 %v1431_v47 }
 0x52d   : > { %v2483_v49 = vpop.f32.mrb[24].mxu1  ;;  %2495 = vmatprep.subr.bf16.mxu0 %v1432_v45 }
 0x52e   : > { %v1398_v29 = vpop.f32.mrb[25].mxu1 }
 0x52f   : > { %v2484_v32 = vpop.f32.mrb[26].mxu1 }
 0x530   : > { %v1434_v50 = vpack.c.bf16 %v2484_v32, %v2483_v49  ;;  %v1401_v52 = vpop.f32.mrb[27].mxu1  ;;  %2496 = vmatpush3.bf16.msra.mxu0 %v1432_v45 }
 0x531   : > { %v1433_v26 = vpack.c.bf16 %v1401_v52, %v1398_v29 }
 0x533   : > { %2497 = vmatprep.subr.bf16.mxu0 %v1433_v26 }
 0x534   : > { %2498 = vmatpush3.bf16.msra.mxu0 %v1433_v26 }
 0x535   : > { %v2487_v43 = vpop.f32.mrb[28].mxu1  ;;  %2499 = vmatprep.subr.bf16.mxu0 %v1434_v50 }
 0x536   : > { %v1414_v12 = vpop.f32.mrb[29].mxu1 }
 0x537   : > { %v2488_v19 = vpop.f32.mrb[30].mxu1 }
 0x538   : > { %v1436_v54 = vpack.c.bf16 %v2488_v19, %v2487_v43  ;;  %v1417_v55 = vpop.f32.mrb[31].mxu1  ;;  %2500 = vmatpush3.bf16.msra.mxu0 %v1434_v50 }
 0x539   : > { %v1435_v57 = vpack.c.bf16 %v1417_v55, %v1414_v12 }
 0x53b   : > { %2501 = vmatprep.subr.bf16.mxu0 %v1435_v57 }
 0x53c   : > { %2502 = vmatpush3.bf16.msra.mxu0 %v1435_v57 }
 0x53d   : > { %2503 = vmatprep.subr.bf16.mxu0 %v1436_v54 }
 0x540   : > { %2504 = vmatpush3.bf16.msra.mxu0 %v1436_v54 }
 0x543   : > { %2506 = vmatmul.mubr.bf16.vlgmr.msra.gmra.mrb[32].mxu0 %v3265_v59 }
 0x544   : > { %2509 = vmatprep.mubr.bf16.mxu0 %v3268_v30 }
 0x54b   : > { %2510 = vmatmul.mubr.bf16.gmra.mrb[36].mxu0 %v3273_v34 }
 0x54c   : > { %2513 = vmatprep.mubr.bf16.mxu0 %v3276_v62 }
 0x553   : > { %2514 = vmatmul.mubr.bf16.gmra.mrb[40].mxu0 %v3281_v31 }
 0x554   : > { %2517 = vmatprep.mubr.bf16.mxu0 %v3284_v23 }
 0x55b   : > { %2518 = vmatmul.mubr.bf16.gmra.mrb[44].mxu0 %v3289_v33 }
 0x55c   : > { %2569 = vmatprep.mubr.bf16.mxu0 %v3243_v53 }
 0x616   : > { %v2507_v61 = vpop.f32.mrb[32].mxu0 }
 0x617   : > { %v1484_v63 = vadd.f32 %v2507_v61, %v2204_v48  ;;  %v1475_v0 = vpop.f32.mrb[33].mxu0 }
 0x618   : > { %v1476_v53 = vadd.f32 %v2204_v48, %v1475_v0  ;;  %v2508_v2 = vpop.f32.mrb[34].mxu0 }
 0x619   : > { %v1487_v3 = vadd.f32 %v2508_v2, %v2204_v48  ;;  %v1478_v4 = vpop.f32.mrb[35].mxu0  ;;  %v1540_v6 = vmax.f32 %v1484_v63, 0.0 }
 0x61a   : > { %v1479_v5 = vadd.f32 %v2204_v48, %v1478_v4  ;;  %v1538_v8 = vmax.f32 %v1476_v53, 0.0 }
 0x61b   : > { %v1541_v51 = vmax.f32 %v1487_v3, 0.0 }
 0x61c   : > { %v1539_v7 = vmax.f32 %v1479_v5, 0.0 }
 0x61d   : > { %v1573_v56 = vpack.c.bf16 %v1541_v51, %v1540_v6 }
 0x61e   : > { %v1572_v11 = vpack.c.bf16 %v1539_v7, %v1538_v8  ;;  %v2511_v16 = vpop.f32.mrb[36].mxu0 }
 0x61f   : > { %v1500_v17 = vadd.f32 %v2511_v16, %v2204_v48  ;;  %v1491_v20 = vpop.f32.mrb[37].mxu0 }
 0x620   : > { %v1492_v10 = vadd.f32 %v2204_v48, %v1491_v20  ;;  %v2512_v21 = vpop.f32.mrb[38].mxu0  ;;  %2537 = vmatprep.mubr.bf16.mxu1 %v1572_v11 }
 0x621   : > { %v1503_v13 = vadd.f32 %v2512_v21, %v2204_v48  ;;  %v1494_v18 = vpop.f32.mrb[39].mxu0  ;;  %2538 = vmatmul.mubr.bf16.vlgmr.msra.gmra.mrb[32].mxu1 %v1573_v56  ;;  %v1544_v35 = vmax.f32 %v1500_v17, 0.0 }
 0x622   : > { %v1495_v24 = vadd.f32 %v2204_v48, %v1494_v18  ;;  %v1542_v1 = vmax.f32 %v1492_v10, 0.0 }
 0x623   : > { %v1545_v22 = vmax.f32 %v1503_v13, 0.0 }
 0x624   : > { %v1543_v41 = vmax.f32 %v1495_v24, 0.0 }
 0x625   : > { %v1575_v36 = vpack.c.bf16 %v1545_v22, %v1544_v35  ;;  %v2802_v22 = vmov 0.0  }
 0x626   : > { %v1574_v27 = vpack.c.bf16 %v1543_v41, %v1542_v1  ;;  %v2515_v9 = vpop.f32.mrb[40].mxu0  ;;  %2585 = vmatprep.subr.bf16.mxu1 %v2802_v22  ;;  %v3379_v1 = vld [vmem:[%s3444_s7 + $0x5] ss:$0 sm:$0xff] }
 0x627   : > { %v1516_v25 = vadd.f32 %v2515_v9, %v2204_v48  ;;  %v1507_v28 = vpop.f32.mrb[41].mxu0 }
 0x628   : > { %v1508_v38 = vadd.f32 %v2204_v48, %v1507_v28  ;;  %v2516_v39 = vpop.f32.mrb[42].mxu0  ;;  %2541 = vmatprep.mubr.bf16.mxu1 %v1574_v27 }
 0x629   : > { %v1519_v40 = vadd.f32 %v2516_v39, %v2204_v48  ;;  %v1510_v14 = vpop.f32.mrb[43].mxu0  ;;  %2542 = vmatmul.mubr.bf16.gmra.mrb[36].mxu1 %v1575_v36  ;;  %v1548_v15 = vmax.f32 %v1516_v25, 0.0 }
 0x62a   : > { %v1511_v37 = vadd.f32 %v2204_v48, %v1510_v14  ;;  %v1546_v44 = vmax.f32 %v1508_v38, 0.0 }
 0x62b   : > { %v1549_v42 = vmax.f32 %v1519_v40, 0.0 }
 0x62c   : > { %v1547_v45 = vmax.f32 %v1511_v37, 0.0 }
 0x62d   : > { %v1577_v46 = vpack.c.bf16 %v1549_v42, %v1548_v15 }
 0x62e   : > { %v1576_v47 = vpack.c.bf16 %v1547_v45, %v1546_v44  ;;  %v2519_v49 = vpop.f32.mrb[44].mxu0 }
 0x62f   : > { %v1532_v29 = vadd.f32 %v2519_v49, %v2204_v48  ;;  %v1523_v32 = vpop.f32.mrb[45].mxu0 }
 0x630   : > { %v1524_v50 = vadd.f32 %v2204_v48, %v1523_v32  ;;  %v2520_v52 = vpop.f32.mrb[46].mxu0  ;;  %2545 = vmatprep.mubr.bf16.mxu1 %v1576_v47 }
 0x631   : > { %v1535_v26 = vadd.f32 %v2520_v52, %v2204_v48  ;;  %v1526_v43 = vpop.f32.mrb[47].mxu0  ;;  %2546 = vmatmul.mubr.bf16.gmra.mrb[40].mxu1 %v1577_v46  ;;  %v1552_v19 = vmax.f32 %v1532_v29, 0.0 }
 0x632   : > { %v1527_v12 = vadd.f32 %v2204_v48, %v1526_v43  ;;  %v1550_v55 = vmax.f32 %v1524_v50, 0.0 }
 0x633   : > { %v1553_v54 = vmax.f32 %v1535_v26, 0.0 }
 0x634   : > { %v1551_v57 = vmax.f32 %v1527_v12, 0.0 }
 0x635   : > { %v1579_v58 = vpack.c.bf16 %v1553_v54, %v1552_v19 }
 0x636   : > { %v1578_v60 = vpack.c.bf16 %v1551_v57, %v1550_v55 }
 0x638   : > { %2549 = vmatprep.mubr.bf16.mxu1 %v1578_v60 }
 0x639   : > { %2550 = vmatmul.mubr.bf16.gmra.mrb[44].mxu1 %v1579_v58 }
 0x63a   : > { %2601 = vmatprep.mubr.msk.bf16.mxu1 %vm2803_vm1, %v2802_v22 }
 0x6f4   : > { %v2539_v61 = vpop.f32.mrb[32].mxu1 }
 0x6f5   : > { %v1662_v63 = vpop.f32.mrb[33].mxu1 }
 0x6f6   : > { %v2540_v0 = vpop.f32.mrb[34].mxu1 }
 0x6f7   : > { %v1726_v53 = vpack.c.bf16 %v2540_v0, %v2539_v61  ;;  %v1665_v2 = vpop.f32.mrb[35].mxu1 }
 0x6f8   : > { %v1725_v3 = vpack.c.bf16 %v1665_v2, %v1662_v63 }
 0x6fa   : > { %2553 = vmatprep.subr.bf16.mxu0 %v1725_v3 }
 0x6fb   : > { %2554 = vmatpush3.bf16.msra.mxu0 %v1725_v3 }
 0x6fc   : > { %v2543_v4 = vpop.f32.mrb[36].mxu1  ;;  %2555 = vmatprep.subr.bf16.mxu0 %v1726_v53 }
 0x6fd   : > { %v1678_v5 = vpop.f32.mrb[37].mxu1 }
 0x6fe   : > { %v2544_v48 = vpop.f32.mrb[38].mxu1 }
 0x6ff   : > { %v1728_v6 = vpack.c.bf16 %v2544_v48, %v2543_v4  ;;  %v1681_v51 = vpop.f32.mrb[39].mxu1  ;;  %2556 = vmatpush3.bf16.msra.mxu0 %v1726_v53 }
 0x700   : > { %v1727_v8 = vpack.c.bf16 %v1681_v51, %v1678_v5 }
 0x702   : > { %2557 = vmatprep.subr.bf16.mxu0 %v1727_v8 }
 0x703   : > { %2558 = vmatpush3.bf16.msra.mxu0 %v1727_v8 }
 0x704   : > { %v2547_v7 = vpop.f32.mrb[40].mxu1  ;;  %2559 = vmatprep.subr.bf16.mxu0 %v1728_v6 }
 0x705   : > { %v1694_v56 = vpop.f32.mrb[41].mxu1 }
 0x706   : > { %v2548_v11 = vpop.f32.mrb[42].mxu1 }
 0x707   : > { %v1730_v16 = vpack.c.bf16 %v2548_v11, %v2547_v7  ;;  %v1697_v17 = vpop.f32.mrb[43].mxu1  ;;  %2560 = vmatpush3.bf16.msra.mxu0 %v1728_v6 }
 0x708   : > { %v1729_v20 = vpack.c.bf16 %v1697_v17, %v1694_v56 }
 0x70a   : > { %2561 = vmatprep.subr.bf16.mxu0 %v1729_v20 }
 0x70b   : > { %2562 = vmatpush3.bf16.msra.mxu0 %v1729_v20 }
 0x70c   : > { %v2551_v10 = vpop.f32.mrb[44].mxu1  ;;  %2563 = vmatprep.subr.bf16.mxu0 %v1730_v16 }
 0x70d   : > { %v1710_v21 = vpop.f32.mrb[45].mxu1 }
 0x70e   : > { %v2552_v13 = vpop.f32.mrb[46].mxu1 }
 0x70f   : > { %v1732_v18 = vpack.c.bf16 %v2552_v13, %v2551_v10  ;;  %v1713_v24 = vpop.f32.mrb[47].mxu1  ;;  %2564 = vmatpush3.bf16.msra.mxu0 %v1730_v16 }
 0x710   : > { %v1731_v35 = vpack.c.bf16 %v1713_v24, %v1710_v21 }
 0x712   : > { %2565 = vmatprep.subr.bf16.mxu0 %v1731_v35 }
 0x713   : > { %2566 = vmatpush3.bf16.msra.mxu0 %v1731_v35 }
 0x714   : > { %2567 = vmatprep.subr.bf16.mxu0 %v1732_v18 }
 0x717   : > { %2568 = vmatpush3.bf16.msra.mxu0 %v1732_v18 }
 0x718   : > { %2605 = vmatprep.subr.bf16.mxu0 %v2802_v22 }
 0x71a   : > { %2570 = vmatmul.mubr.bf16.vlgmr.msra.gmra.mrb[48].mxu0 %v3265_v59  ;;  %v2703_v59 = vld [vmem:[%s3442_s5] sm:$0xff]  }
 0x71b   : > { %2573 = vmatprep.mubr.bf16.mxu0 %v3268_v30  ;;  %2606 = vmatpush3.bf16.msra.mxu0 %v2703_v59  ;;  %v2704_v30 = vld [vmem:[%s3442_s5 + $0x8] sm:$0xff]  }
 0x71c   : > { %2607 = vmatprep.subr.bf16.mxu0 %v2802_v22 }
 0x71f   : > { %2608 = vmatpush3.bf16.msra.mxu0 %v2704_v30  ;;  %v1850_v30 = vld [vmem:[%s474_s25] sm:$0xff] }
 0x720   : > { %2609 = vmatprep.subr.bf16.mxu0 %v2802_v22 }
 0x722   : > { %2574 = vmatmul.mubr.bf16.gmra.mrb[52].mxu0 %v3273_v34  ;;  %v2705_v34 = vld [vmem:[%s3442_s5 + $0x10] sm:$0xff]  }
 0x723   : > { %2577 = vmatprep.mubr.bf16.mxu0 %v3276_v62  ;;  %2610 = vmatpush3.bf16.msra.mxu0 %v2705_v34  ;;  %v2706_v62 = vld [vmem:[%s3442_s5 + $0x18] sm:$0xff]   ;;  %v1851_v34 = vpack.c.bf16 %v1850_v30, %v1850_v30 }
 0x724   : > { %2611 = vmatprep.subr.bf16.mxu0 %v2802_v22 }
 0x727   : > { %2612 = vmatpush3.bf16.msra.mxu0 %v2706_v62  ;;  %v2710_v62 = vld [vmem:[%s3442_s5 + $0x38] sm:$0xff]  }
 0x728   : > { %2613 = vmatprep.subr.bf16.mxu0 %v2802_v22 }
 0x72a   : > { %2578 = vmatmul.mubr.bf16.gmra.mrb[56].mxu0 %v3281_v31  ;;  %v2707_v31 = vld [vmem:[%s3442_s5 + $0x20] sm:$0xff]  }
 0x72b   : > { %2581 = vmatprep.mubr.bf16.mxu0 %v3284_v23  ;;  %2614 = vmatpush3.bf16.msra.mxu0 %v2707_v31  ;;  %v2708_v23 = vld [vmem:[%s3442_s5 + $0x28] sm:$0xff]  }
 0x72c   : > { %2615 = vmatprep.subr.bf16.mxu0 %v2802_v22 }
 0x72f   : > { %2616 = vmatpush3.bf16.msra.mxu0 %v2708_v23 }
 0x730   : > { %2617 = vmatprep.subr.bf16.mxu0 %v2802_v22 }
 0x732   : > { %2582 = vmatmul.mubr.bf16.gmra.mrb[60].mxu0 %v3289_v33  ;;  %v2709_v33 = vld [vmem:[%s3442_s5 + $0x30] sm:$0xff]  }
 0x733   : > { %2621 = vmatprep.mubr.msk.bf16.mxu0 %vm2803_vm1, %v2802_v22  ;;  %2618 = vmatpush3.bf16.msra.mxu0 %v2709_v33 }
 0x734   : > { %2619 = vmatprep.subr.bf16.mxu0 %v2802_v22 }
 0x737   : > { %2620 = vmatpush3.bf16.msra.mxu0 %v2710_v62 }
 0x7ed   : > { %v2571_v41 = vpop.f32.mrb[48].mxu0 }
 0x7ee   : > { %v1780_v36 = vadd.f32 %v2571_v41, %v3379_v1  ;;  %v1771_v27 = vpop.f32.mrb[49].mxu0 }
 0x7ef   : > { %v1772_v9 = vadd.f32 %v3379_v1, %v1771_v27  ;;  %v2572_v25 = vpop.f32.mrb[50].mxu0 }
 0x7f0   : > { %v1783_v28 = vadd.f32 %v2572_v25, %v3379_v1  ;;  %v1774_v38 = vpop.f32.mrb[51].mxu0  ;;  %v1836_v40 = vmax.f32 %v1780_v36, 0.0  ;;  %v2230_v36 = vld [vmem:[%s3444_s7 + $0x6] ss:$0 sm:$0xff] }
 0x7f1   : > { %v1775_v39 = vadd.f32 %v3379_v1, %v1774_v38  ;;  %v1834_v37 = vmax.f32 %v1772_v9, 0.0 }
 0x7f2   : > { %v1837_v14 = vmax.f32 %v1783_v28, 0.0  ;;  %v2239_v28 = vld [vmem:[%s3443_s6] ss:$0 sm:$0xff] }
 0x7f3   : > { %v1835_v15 = vmax.f32 %v1775_v39, 0.0 }
 0x7f4   : > { %v1853_v42 = vpack.c.bf16 %v1837_v14, %v1836_v40 }
 0x7f5   : > { %v1852_v44 = vpack.c.bf16 %v1835_v15, %v1834_v37  ;;  %v2575_v45 = vpop.f32.mrb[52].mxu0  ;;  %v2804_v37 = vmov 64  }
 0x7f6   : > { %v1796_v46 = vadd.f32 %v2575_v45, %v3379_v1  ;;  %v1787_v47 = vpop.f32.mrb[53].mxu0  ;;  %2665 = vset.pattern.permute.xlu1 %v2804_v37  ;;  %2666 = vset.pattern.permute.xlu0 %v2804_v37 }
 0x7f7   : > { %v1788_v49 = vadd.f32 %v3379_v1, %v1787_v47  ;;  %v2576_v29 = vpop.f32.mrb[54].mxu0  ;;  %2586 = vmatpush3.bf16.msra.mxu1 %v1852_v44 }
 0x7f8   : > { %v1799_v32 = vadd.f32 %v2576_v29, %v3379_v1  ;;  %v1790_v50 = vpop.f32.mrb[55].mxu0  ;;  %2587 = vmatprep.subr.bf16.mxu1 %v2802_v22  ;;  %v1840_v26 = vmax.f32 %v1796_v46, 0.0 }
 0x7f9   : > { %v1791_v52 = vadd.f32 %v3379_v1, %v1790_v50  ;;  %v1838_v12 = vmax.f32 %v1788_v49, 0.0 }
 0x7fa   : > { %v1841_v43 = vmax.f32 %v1799_v32, 0.0 }
 0x7fb   : > { %v1839_v19 = vmax.f32 %v1791_v52, 0.0  ;;  %2588 = vmatpush3.bf16.msra.mxu1 %v1853_v42 }
 0x7fc   : > { %v1855_v54 = vpack.c.bf16 %v1841_v43, %v1840_v26  ;;  %2589 = vmatprep.subr.bf16.mxu1 %v2802_v22 }
 0x7fd   : > { %v1854_v55 = vpack.c.bf16 %v1839_v19, %v1838_v12  ;;  %v2579_v57 = vpop.f32.mrb[56].mxu0 }
 0x7fe   : > { %v1812_v58 = vadd.f32 %v2579_v57, %v3379_v1  ;;  %v1803_v60 = vpop.f32.mrb[57].mxu0 }
 0x7ff   : > { %v1804_v61 = vadd.f32 %v3379_v1, %v1803_v60  ;;  %v2580_v63 = vpop.f32.mrb[58].mxu0  ;;  %2590 = vmatpush3.bf16.msra.mxu1 %v1854_v55 }
 0x800   : > { %v1815_v0 = vadd.f32 %v2580_v63, %v3379_v1  ;;  %v1806_v53 = vpop.f32.mrb[59].mxu0  ;;  %2591 = vmatprep.subr.bf16.mxu1 %v2802_v22  ;;  %v1844_v3 = vmax.f32 %v1812_v58, 0.0 }
 0x801   : > { %v1807_v2 = vadd.f32 %v3379_v1, %v1806_v53  ;;  %v1842_v5 = vmax.f32 %v1804_v61, 0.0 }
 0x802   : > { %v1845_v4 = vmax.f32 %v1815_v0, 0.0 }
 0x803   : > { %v1843_v48 = vmax.f32 %v1807_v2, 0.0  ;;  %2592 = vmatpush3.bf16.msra.mxu1 %v1855_v54 }
 0x804   : > { %v1857_v6 = vpack.c.bf16 %v1845_v4, %v1844_v3  ;;  %2593 = vmatprep.subr.bf16.mxu1 %v2802_v22 }
 0x805   : > { %v1856_v51 = vpack.c.bf16 %v1843_v48, %v1842_v5  ;;  %v2583_v8 = vpop.f32.mrb[60].mxu0 }
 0x806   : > { %v1828_v7 = vadd.f32 %v2583_v8, %v3379_v1  ;;  %v1819_v56 = vpop.f32.mrb[61].mxu0 }
 0x807   : > { %v1820_v11 = vadd.f32 %v3379_v1, %v1819_v56  ;;  %v2584_v16 = vpop.f32.mrb[62].mxu0  ;;  %2594 = vmatpush3.bf16.msra.mxu1 %v1856_v51 }
 0x808   : > { %v1831_v17 = vadd.f32 %v2584_v16, %v3379_v1  ;;  %v1822_v20 = vpop.f32.mrb[63].mxu0  ;;  %2595 = vmatprep.subr.bf16.mxu1 %v2802_v22  ;;  %v1848_v21 = vmax.f32 %v1828_v7, 0.0 }
 0x809   : > { %v1823_v10 = vadd.f32 %v3379_v1, %v1822_v20  ;;  %v1846_v18 = vmax.f32 %v1820_v11, 0.0 }
 0x80a   : > { %v1849_v13 = vmax.f32 %v1831_v17, 0.0 }
 0x80b   : > { %v1847_v24 = vmax.f32 %v1823_v10, 0.0  ;;  %2596 = vmatpush3.bf16.msra.mxu1 %v1857_v6 }
 0x80c   : > { %v1859_v35 = vpack.c.bf16 %v1849_v13, %v1848_v21  ;;  %2597 = vmatprep.subr.bf16.mxu1 %v2802_v22 }
 0x80d   : > { %v1858_v59 = vpack.c.bf16 %v1847_v24, %v1846_v18 }
 0x80f   : > { %2598 = vmatpush3.bf16.msra.mxu1 %v1858_v59 }
 0x810   : > { %2599 = vmatprep.subr.bf16.mxu1 %v2802_v22 }
 0x813   : > { %2600 = vmatpush3.bf16.msra.mxu1 %v1859_v35 }
 0x816   : > { %2602 = vmatmul.mubr.bf16.vlgmr.msra.gmra.mrb[48].mxu1 %v1851_v34 }
 0x8e9   : > { %v1894_v31 = vpop.f32.mrb[48].mxu1 }
 0x8ea   : > { %v1900_v23 = vpack.c.bf16 %v1894_v31, %v1894_v31  ;;  %v2603_v33 = vpop.f32.mrb[49].mxu1 }
 0x8eb   : > { %v1897_v1 = vpop.f32.mrb[50].mxu1 }
 0x8ec   : > { %v2604_v41 = vpop.f32.mrb[51].mxu1  ;;  %2622 = vmatmul.mubr.bf16.vlgmr.msra.gmra.mrb[64].mxu0 %v1900_v23 }
 0x9bf   : > { %v2003_v27 = vpop.f32.mrb[64].mxu0 }
 0x9c0   : > { %v2004_v22 = vadd.f32 %v2230_v36, %v2003_v27  ;;  %v2623_v9 = vpop.f32.mrb[65].mxu0 }
 0x9c1   : > { %v2006_v25 = vpop.f32.mrb[66].mxu0 }
 0x9c2   : > { %v2009_v38 = vmax.f32 %v2004_v22, 0.0  ;;  %v2624_v39 = vpop.f32.mrb[67].mxu0 }
 0x9c4   : > { %v2017_v40 = vmul.f32 %v2239_v28, %v2009_v38 }
 0x9c6   : > { %v2018_v14 = vsel %vm544_vm0, %v2017_v40, 0.0 }
 0x9c7   : > { %2019 = vadd.xlane.f32.xlu0 %v2018_v14 }
 0xa54   : > { %v2020_v15 = vpop.xlane.xlu0 %2019 }
 0xa55   : > { %v2021_v42 = vadd.f32 %v2230_v36, %v2020_v15 }
 0xa57   : > { %2024 = vperm.xlu1 %2665, %v2021_v42  }
 0xad6   : > { %v2025_v44 = vpop.permute.xlu1 %2024 }
 0xad7   : > { %2027 = vst [vmem:[%s478_s19] sm:$0xff] %v2025_v44 }
 0xad8 PF: > { %p16_p13 = scmp.ge.s32.totalorder %s2869_s9, 4   ;;  %s3455_s27 = smov %s2793_s28 }
 0xad9   : > { %s3456_s28 = smov %s2880_s13  ;;  %s3457_s29 = smov %s2869_s9 }
 0xada   :  { %18 = sbr.rel (!%p16_p13) target bundleno = 2 (0x2), region = 141 }
 0xae1   :  { %2047 = vsyncpa [#allocation4], 1 }
 0xae2   :  { %2049 = vsyncpa [#allocation4 + $0x1], 1 }

</bundles_post_ra>
